<compile_context>
chip_gen: v7x
topology: tpu7x:2x2x1
jax: 0.10.0
libtpu: 0.0.40
codegen_flags: <defaults>
</compile_context>

<pallas_src>
import functools

import jax
import jax.numpy as jnp
from jax.experimental import pallas as pl
from jax.experimental.pallas import tpu as pltpu

# Logical (PyTorch) dims.
D_IN, D_H1, D_H2, D_OUT = 50, 100, 500, 1250
# Lane-aligned (padded) dims used for the contraction axes inside the kernel.
P_IN, P_H1, P_H2 = 64, 128, 512


def _round_up(x, m):
    return (x + m - 1) // m * m


def mlp_kernel(x_ref, w1_ref, b1_ref, w2_ref, b2_ref, w3_ref, b3_ref, o_ref):
    # Layer 1: Linear(64 -> 128) + ReLU   (bf16 operands, f32 MXU accumulate)
    h1 = jnp.dot(x_ref[...], w1_ref[...], preferred_element_type=jnp.float32)
    h1 = jnp.maximum(h1 + b1_ref[...], 0.0).astype(jnp.bfloat16)

    # Layer 2: Linear(128 -> 512) + ReLU
    h2 = jnp.dot(h1, w2_ref[...], preferred_element_type=jnp.float32)
    h2 = jnp.maximum(h2 + b2_ref[...], 0.0).astype(jnp.bfloat16)

    # Layer 3: Linear(512 -> 1250) + Sigmoid, stored at logical width (no
    # padded output lanes, no post-kernel column slice).
    z = jnp.dot(h2, w3_ref[...], preferred_element_type=jnp.float32) + b3_ref[...]
    o_ref[...] = jax.nn.sigmoid(z).astype(o_ref.dtype)


@functools.partial(jax.jit, static_argnames=("tb", "out_dtype"))
def simple3nn_forward(x, padded_params, *, tb=512, out_dtype=jnp.bfloat16):
    """x: (B, 50) f32.  padded_params: bf16 padded weights + f32 padded biases."""
    w1, b1, w2, b2, w3, b3 = padded_params
    B = x.shape[0]

    # Pad batch only to a multiple of 8 sublanes, then pick a balanced tiling.
    B8 = _round_up(max(B, 1), 8)
    # >= 2 grid steps whenever possible so v7x can shard the 'parallel' batch
    # axis across its two TensorCores (harmless on single-TC v5e/v6e).
    n_tiles = max(pl.cdiv(B8, tb), 2 if B8 >= 16 else 1)
    TB = _round_up(pl.cdiv(B8, n_tiles), 8)
    B_pad = n_tiles * TB

    # Zero-pad batch rows and input features; pre-cast to bf16 once here
    # (padded K columns multiply zero weights -> valid lanes stay exact).
    x_p = jnp.pad(x, ((0, B_pad - B), (0, P_IN - D_IN))).astype(jnp.bfloat16)

    resident = lambda r, c: pl.BlockSpec((r, c), lambda i: (0, 0))

    out = pl.pallas_call(
        mlp_kernel,
        out_shape=jax.ShapeDtypeStruct((B_pad, D_OUT), out_dtype),
        grid=(n_tiles,),
        in_specs=[
            pl.BlockSpec((TB, P_IN), lambda i: (i, 0)),   # x tile (bf16), pipelined
            resident(P_IN, P_H1), resident(1, P_H1),      # w1 (bf16), b1 (f32)
            resident(P_H1, P_H2), resident(1, P_H2),      # w2, b2
            resident(P_H2, D_OUT), resident(1, D_OUT),    # w3, b3 (logical width)
        ],
        out_specs=pl.BlockSpec((TB, D_OUT), lambda i: (i, 0)),
        compiler_params=pltpu.CompilerParams(
            dimension_semantics=("parallel",),
            vmem_limit_bytes=40 * 1024 * 1024),
    )(x_p, w1, b1, w2, b2, w3, b3)

    # Only the (at most 7) padded batch rows are dropped; no column slice.
    return out if B == B_pad else out[:B]


def init_params(key):
    """Deterministic init mimicking PyTorch nn.Linear default U(-1/sqrt(fan_in), +).

    Weights are stored (in, out) so y = x @ W + b (== PyTorch x @ W.T + b)."""
    def linear(key, fan_in, fan_out):
        kw, kb = jax.random.split(key)
        bound = 1.0 / jnp.sqrt(fan_in)
        w = jax.random.uniform(kw, (fan_in, fan_out), jnp.float32, -bound, bound)
        b = jax.random.uniform(kb, (1, fan_out), jnp.float32, -bound, bound)
        return w, b

    k1, k2, k3 = jax.random.split(key, 3)
    w1, b1 = linear(k1, D_IN, D_H1)
    w2, b2 = linear(k2, D_H1, D_H2)
    w3, b3 = linear(k3, D_H2, D_OUT)
    return (w1, b1, w2, b2, w3, b3)


def pack_params(params):
    """Zero-pad contraction dims to lane-aligned sizes; weights -> bf16, biases f32.

    Layer-3 output dim is kept at its logical width 1250."""
    w1, b1, w2, b2, w3, b3 = params

    def pad_w(w, rows, cols):
        return jnp.pad(w, ((0, rows - w.shape[0]), (0, cols - w.shape[1])))

    def pad_b(b, cols):
        return jnp.pad(b, ((0, 0), (0, cols - b.shape[1])))

    return (
        pad_w(w1, P_IN, P_H1).astype(jnp.bfloat16), pad_b(b1, P_H1),
        pad_w(w2, P_H1, P_H2).astype(jnp.bfloat16), pad_b(b2, P_H2),
        pad_w(w3, P_H2, D_OUT).astype(jnp.bfloat16), b3,
    )


def reference_forward_bf16(x, params):
    """Numerics-matched reference: bf16 operands, f32 MXU-style accumulation."""
    w1, b1, w2, b2, w3, b3 = params
    bf = jnp.bfloat16
    h1 = jnp.maximum(
        jnp.dot(x.astype(bf), w1.astype(bf), preferred_element_type=jnp.float32) + b1, 0.0)
    h2 = jnp.maximum(
        jnp.dot(h1.astype(bf), w2.astype(bf), preferred_element_type=jnp.float32) + b2, 0.0)
    z = jnp.dot(h2.astype(bf), w3.astype(bf), preferred_element_type=jnp.float32) + b3
    return jax.nn.sigmoid(z)


def reference_forward_f32(x, params):
    """Full-precision reference matching the original f32 PyTorch module."""
    w1, b1, w2, b2, w3, b3 = params
    h1 = jnp.maximum(x @ w1 + b1, 0.0)
    h2 = jnp.maximum(h1 @ w2 + b2, 0.0)
    return jax.nn.sigmoid(h2 @ w3 + b3)


if __name__ == "__main__":
    key = jax.random.PRNGKey(0)
    kx, kp = jax.random.split(key)

    B = 8
    x = jax.random.normal(kx, (B, D_IN), dtype=jnp.float32)
    params = init_params(kp)
    padded_params = pack_params(params)

    out = simple3nn_forward(x, padded_params)
    out = jax.block_until_ready(out)

    assert out.shape == (B, D_OUT), out.shape
    out_f32 = out.astype(jnp.float32)

    # Tight check against a bf16-matched reference (validates the kernel path).
    ref_bf = reference_forward_bf16(x, params)
    assert jnp.allclose(out_f32, ref_bf, atol=5e-3, rtol=5e-3), \
        float(jnp.max(jnp.abs(out_f32 - ref_bf)))

    # Loose check against the true f32 module semantics (bf16 precision tradeoff).
    ref_f32 = reference_forward_f32(x, params)
    assert jnp.allclose(out_f32, ref_f32, atol=2e-2, rtol=2e-2), \
        float(jnp.max(jnp.abs(out_f32 - ref_f32)))

    print("KERNEL_OK")
</pallas_src>

<mosaic_0001>
module attributes {stable_mosaic.version = 11 : i64} {
  func.func @mlp_kernel(%arg0: i32, %arg1: memref<8x64xbf16, #tpu.memory_space<vmem>>, %arg2: memref<64x128xbf16, #tpu.memory_space<vmem>>, %arg3: memref<1x128xf32, #tpu.memory_space<vmem>>, %arg4: memref<128x512xbf16, #tpu.memory_space<vmem>>, %arg5: memref<1x512xf32, #tpu.memory_space<vmem>>, %arg6: memref<512x1250xbf16, #tpu.memory_space<vmem>>, %arg7: memref<1x1250xf32, #tpu.memory_space<vmem>>, %arg8: memref<8x1250xbf16, #tpu.memory_space<vmem>>) attributes {dimension_semantics = [#tpu.dimension_semantics<parallel>], iteration_bounds = array<i64: 1>, scalar_prefetch = 0 : i64, scratch_operands = 0 : i64, tpu.core_type = #tpu.core_type<tc>, window_params = [{transform_indices = @transform_0, window_bounds = array<i64: 8, 64>}, {pipeline_mode = #tpu.pipeline_mode<synchronous>, transform_indices = @transform_1, window_bounds = array<i64: 64, 128>}, {pipeline_mode = #tpu.pipeline_mode<synchronous>, transform_indices = @transform_2, window_bounds = array<i64: 1, 128>}, {pipeline_mode = #tpu.pipeline_mode<synchronous>, transform_indices = @transform_3, window_bounds = array<i64: 128, 512>}, {pipeline_mode = #tpu.pipeline_mode<synchronous>, transform_indices = @transform_4, window_bounds = array<i64: 1, 512>}, {pipeline_mode = #tpu.pipeline_mode<synchronous>, transform_indices = @transform_5, window_bounds = array<i64: 512, 1250>}, {pipeline_mode = #tpu.pipeline_mode<synchronous>, transform_indices = @transform_6, window_bounds = array<i64: 1, 1250>}, {transform_indices = @transform_7, window_bounds = array<i64: 8, 1250>}]} {
    %c0 = arith.constant 0 : index
    %c0_0 = arith.constant 0 : index
    %0 = vector.load %arg1[%c0, %c0_0] : memref<8x64xbf16, #tpu.memory_space<vmem>>, vector<8x64xbf16>
    %c0_1 = arith.constant 0 : index
    %c0_2 = arith.constant 0 : index
    %1 = vector.load %arg2[%c0_1, %c0_2] : memref<64x128xbf16, #tpu.memory_space<vmem>>, vector<64x128xbf16>
    %cst = arith.constant dense<0.000000e+00> : vector<8x128xf32>
    %2 = tpu.matmul %0, %1, %cst {dimension_numbers = #tpu.dot_dimension_numbers<[1], [0], [0], [1], [0, 0, 1, 1], [], []>} : vector<8x64xbf16>, vector<64x128xbf16>, vector<8x128xf32> -> vector<8x128xf32>
    %c0_3 = arith.constant 0 : index
    %c0_4 = arith.constant 0 : index
    %3 = vector.load %arg3[%c0_3, %c0_4] : memref<1x128xf32, #tpu.memory_space<vmem>>, vector<1x128xf32>
    %4 = vector.broadcast %3 : vector<1x128xf32> to vector<8x128xf32>
    %5 = arith.addf %2, %4 : vector<8x128xf32>
    %cst_5 = arith.constant 0.000000e+00 : f32
    %6 = vector.broadcast %cst_5 : f32 to vector<8x128xf32>
    %7 = arith.maximumf %5, %6 : vector<8x128xf32>
    %8 = arith.truncf %7 : vector<8x128xf32> to vector<8x128xbf16>
    %c0_6 = arith.constant 0 : index
    %c0_7 = arith.constant 0 : index
    %9 = vector.load %arg4[%c0_6, %c0_7] : memref<128x512xbf16, #tpu.memory_space<vmem>>, vector<128x512xbf16>
    %cst_8 = arith.constant dense<0.000000e+00> : vector<8x512xf32>
    %10 = tpu.matmul %8, %9, %cst_8 {dimension_numbers = #tpu.dot_dimension_numbers<[1], [0], [0], [1], [0, 0, 1, 1], [], []>} : vector<8x128xbf16>, vector<128x512xbf16>, vector<8x512xf32> -> vector<8x512xf32>
    %c0_9 = arith.constant 0 : index
    %c0_10 = arith.constant 0 : index
    %11 = vector.load %arg5[%c0_9, %c0_10] : memref<1x512xf32, #tpu.memory_space<vmem>>, vector<1x512xf32>
    %12 = vector.broadcast %11 : vector<1x512xf32> to vector<8x512xf32>
    %13 = arith.addf %10, %12 : vector<8x512xf32>
    %cst_11 = arith.constant 0.000000e+00 : f32
    %14 = vector.broadcast %cst_11 : f32 to vector<8x512xf32>
    %15 = arith.maximumf %13, %14 : vector<8x512xf32>
    %16 = arith.truncf %15 : vector<8x512xf32> to vector<8x512xbf16>
    %c0_12 = arith.constant 0 : index
    %c0_13 = arith.constant 0 : index
    %17 = vector.load %arg6[%c0_12, %c0_13] : memref<512x1250xbf16, #tpu.memory_space<vmem>>, vector<512x1250xbf16>
    %cst_14 = arith.constant dense<0.000000e+00> : vector<8x1250xf32>
    %18 = tpu.matmul %16, %17, %cst_14 {dimension_numbers = #tpu.dot_dimension_numbers<[1], [0], [0], [1], [0, 0, 1, 1], [], []>} : vector<8x512xbf16>, vector<512x1250xbf16>, vector<8x1250xf32> -> vector<8x1250xf32>
    %c0_15 = arith.constant 0 : index
    %c0_16 = arith.constant 0 : index
    %19 = vector.load %arg7[%c0_15, %c0_16] : memref<1x1250xf32, #tpu.memory_space<vmem>>, vector<1x1250xf32>
    %20 = vector.broadcast %19 : vector<1x1250xf32> to vector<8x1250xf32>
    %21 = arith.addf %18, %20 : vector<8x1250xf32>
    %22 = arith.negf %21 : vector<8x1250xf32>
    %23 = math.exp %22 : vector<8x1250xf32>
    %cst_17 = arith.constant 1.000000e+00 : f32
    %24 = vector.broadcast %cst_17 : f32 to vector<8x1250xf32>
    %25 = arith.addf %24, %23 : vector<8x1250xf32>
    %26 = arith.divf %24, %25 : vector<8x1250xf32>
    %27 = arith.truncf %26 : vector<8x1250xf32> to vector<8x1250xbf16>
    %c0_18 = arith.constant 0 : index
    %c0_19 = arith.constant 0 : index
    %28 = vector.load %arg8[%c0_18, %c0_19] : memref<8x1250xbf16, #tpu.memory_space<vmem>>, vector<8x1250xbf16>
    tpu.vector_store %arg8[%c0_18, %c0_19], %27 {strides = array<i32>} : memref<8x1250xbf16, #tpu.memory_space<vmem>>, vector<8x1250xbf16>,
    return
  }
  func.func @transform_0(%arg0: i32) -> (i32, i32) {
    %c0_i32 = arith.constant 0 : i32
    %c0_i32_0 = arith.constant 0 : i32
    return %arg0, %c0_i32 : i32, i32
  }
  func.func @transform_1(%arg0: i32) -> (i32, i32) {
    %c0_i32 = arith.constant 0 : i32
    %c0_i32_0 = arith.constant 0 : i32
    %c0_i32_1 = arith.constant 0 : i32
    return %c0_i32, %c0_i32_0 : i32, i32
  }
  func.func @transform_2(%arg0: i32) -> (i32, i32) {
    %c0_i32 = arith.constant 0 : i32
    %c0_i32_0 = arith.constant 0 : i32
    %c0_i32_1 = arith.constant 0 : i32
    return %c0_i32, %c0_i32_0 : i32, i32
  }
  func.func @transform_3(%arg0: i32) -> (i32, i32) {
    %c0_i32 = arith.constant 0 : i32
    %c0_i32_0 = arith.constant 0 : i32
    %c0_i32_1 = arith.constant 0 : i32
    return %c0_i32, %c0_i32_0 : i32, i32
  }
  func.func @transform_4(%arg0: i32) -> (i32, i32) {
    %c0_i32 = arith.constant 0 : i32
    %c0_i32_0 = arith.constant 0 : i32
    %c0_i32_1 = arith.constant 0 : i32
    return %c0_i32, %c0_i32_0 : i32, i32
  }
  func.func @transform_5(%arg0: i32) -> (i32, i32) {
    %c0_i32 = arith.constant 0 : i32
    %c0_i32_0 = arith.constant 0 : i32
    %c0_i32_1 = arith.constant 0 : i32
    return %c0_i32, %c0_i32_0 : i32, i32
  }
  func.func @transform_6(%arg0: i32) -> (i32, i32) {
    %c0_i32 = arith.constant 0 : i32
    %c0_i32_0 = arith.constant 0 : i32
    %c0_i32_1 = arith.constant 0 : i32
    return %c0_i32, %c0_i32_0 : i32, i32
  }
  func.func @transform_7(%arg0: i32) -> (i32, i32) {
    %c0_i32 = arith.constant 0 : i32
    %c0_i32_0 = arith.constant 0 : i32
    return %arg0, %c0_i32 : i32, i32
  }
}

</mosaic_0001>

<bundles_post_ra>
// kernel: simple3nn_forward.1
= control target key start
LH: loop header
LB: loop body
LE: loop exit
PB: predicated region body
PF: predicated region fallthrough
CT: control target
= control target key end

     0   :  { %v3947_v1 = vmov 0.0   ;;  %vm3948_vm0 = vmmov 0   ;;  %vm68_vm1 = vcmask 523264   ;;  %v3949_v38 = vmov 0   ;;  %s5152_s0 = inlined_call_operand.vmem [shape: bf16[8,64], index: 0, kind: input, shape index: {}]   ;;  %s5153_s1 = inlined_call_operand.vmem [shape: bf16[64,128], index: 1, kind: input, shape index: {}]   ;;  %s5154_s2 = inlined_call_operand.vmem [shape: f32[1,128], index: 2, kind: input, shape index: {}]   ;;  %s5155_s3 = inlined_call_operand.vmem [shape: bf16[128,512], index: 3, kind: input, shape index: {}]   ;;  %s5156_s4 = inlined_call_operand.vmem [shape: f32[1,512], index: 4, kind: input, shape index: {}]   ;;  %s5157_s5 = inlined_call_operand.vmem [shape: bf16[512,1250], index: 5, kind: input, shape index: {}]   ;;  %s5158_s6 = inlined_call_operand.vmem [shape: f32[1,1250], index: 6, kind: input, shape index: {}]   ;;  %s5159_s7 = inlined_call_operand.hbm [shape: bf16[8,1250], index: 7, kind: output, shape index: {}]  }
   0x1   :  { %v3351_v0 = vld [vmem:[%s5153_s1] sm:$0xff]   ;;  %3307 = vmatprep.subr.bf16.mxu0 %v3947_v1  ;;  %v3352_v2 = vld [vmem:[%s5153_s1 + $0x8] sm:$0xff]   ;;  %3315 = vmatprep.mubr.msk.bf16.mxu0 %vm3948_vm0, %v3947_v1  ;;  %v3353_v4 = vld [vmem:[%s5153_s1 + $0x10] sm:$0xff]  }
   0x2   :  { %3308 = vmatpush3.bf16.msra.mxu0 %v3351_v0  ;;  %v3355_v3 = vld [vmem:[%s5155_s3 + $0x4] ss:$16 sps:$4 sm:$0xff]   ;;  %v3360_v5 = vld [vmem:[%s5155_s3] ss:$16 sps:$4 sm:$0xff]   ;;  %v3354_v7 = vld [vmem:[%s5153_s1 + $0x18] sm:$0xff]   ;;  %360 = vmatprep.mubr.bf16.mxu1 %v3949_v38 }
   0x3   :  { %3309 = vmatprep.subr.bf16.mxu0 %v3947_v1  ;;  %328 = vmatprep.subr.bf16.mxu1 %v3355_v3  ;;  %v3361_v6 = vld [vmem:[%s5155_s3 + $0x24] ss:$16 sps:$4 sm:$0xff]   ;;  %v3366_v8 = vld [vmem:[%s5155_s3 + $0x20] ss:$16 sps:$4 sm:$0xff]   ;;  %v3359_v10 = vld [vmem:[%s5155_s3 + $0xc] ss:$16 sps:$4 sm:$0xff]  }
   0x4   :  { %329 = vmatpush1.bf16.msra.mxu1 %v3360_v5  ;;  %v3367_v9 = vld [vmem:[%s5155_s3 + $0x44] ss:$16 sps:$4 sm:$0xff]   ;;  %v3372_v11 = vld [vmem:[%s5155_s3 + $0x40] ss:$16 sps:$4 sm:$0xff]   ;;  %v3357_v14 = vld [vmem:[%s5155_s3 + $0x8] ss:$16 sps:$4 sm:$0xff]  }
   0x5   :  { %330 = vmatprep.subr.bf16.mxu1 %v3361_v6  ;;  %v3373_v12 = vld [vmem:[%s5155_s3 + $0x64] ss:$16 sps:$4 sm:$0xff]   ;;  %v28_v13 = vld [vmem:[%s5152_s0] sm:$0xf]  ;;  %v3365_v15 = vld [vmem:[%s5155_s3 + $0x2c] ss:$16 sps:$4 sm:$0xff]  }
   0x6   :  { %3310 = vmatpush3.bf16.msra.mxu0 %v3352_v2  ;;  %v3378_v16 = vld [vmem:[%s5155_s3 + $0x60] ss:$16 sps:$4 sm:$0xff]   ;;  %v3379_v17 = vld [vmem:[%s5155_s3 + $0x84] ss:$16 sps:$4 sm:$0xff]   ;;  %v3363_v18 = vld [vmem:[%s5155_s3 + $0x28] ss:$16 sps:$4 sm:$0xff]  }
   0x7   :  { %3311 = vmatprep.subr.bf16.mxu0 %v3947_v1  ;;  %v3371_v19 = vld [vmem:[%s5155_s3 + $0x4c] ss:$16 sps:$4 sm:$0xff]   ;;  %v3384_v20 = vld [vmem:[%s5155_s3 + $0x80] ss:$16 sps:$4 sm:$0xff]   ;;  %v3385_v21 = vld [vmem:[%s5155_s3 + $0xa4] ss:$16 sps:$4 sm:$0xff]  }
   0x8   :  { %331 = vmatpush1.bf16.msra.mxu1 %v3366_v8  ;;  %v3369_v22 = vld [vmem:[%s5155_s3 + $0x48] ss:$16 sps:$4 sm:$0xff]   ;;  %v3377_v23 = vld [vmem:[%s5155_s3 + $0x6c] ss:$16 sps:$4 sm:$0xff]   ;;  %v3390_v24 = vld [vmem:[%s5155_s3 + $0xa0] ss:$16 sps:$4 sm:$0xff]  }
   0x9   :  { %332 = vmatprep.subr.bf16.mxu1 %v3367_v9  ;;  %v3391_v25 = vld [vmem:[%s5155_s3 + $0xc4] ss:$16 sps:$4 sm:$0xff]   ;;  %v3375_v26 = vld [vmem:[%s5155_s3 + $0x68] ss:$16 sps:$4 sm:$0xff]   ;;  %v3383_v27 = vld [vmem:[%s5155_s3 + $0x8c] ss:$16 sps:$4 sm:$0xff]  }
   0xa   :  { %3312 = vmatpush3.bf16.msra.mxu0 %v3353_v4  ;;  %v3381_v28 = vld [vmem:[%s5155_s3 + $0x88] ss:$16 sps:$4 sm:$0xff]   ;;  %v3389_v29 = vld [vmem:[%s5155_s3 + $0xac] ss:$16 sps:$4 sm:$0xff]   ;;  %v3396_v33 = vld [vmem:[%s5155_s3 + $0xc0] ss:$16 sps:$4 sm:$0xff]  }
   0xb   :  { %3313 = vmatprep.subr.bf16.mxu0 %v3947_v1  ;;  %v3387_v30 = vld [vmem:[%s5155_s3 + $0xa8] ss:$16 sps:$4 sm:$0xff]   ;;  %v3395_v31 = vld [vmem:[%s5155_s3 + $0xcc] ss:$16 sps:$4 sm:$0xff]   ;;  %v3397_v34 = vld [vmem:[%s5155_s3 + $0xe4] ss:$16 sps:$4 sm:$0xff]  }
   0xc   :  { %333 = vmatpush1.bf16.msra.mxu1 %v3372_v11  ;;  %v3393_v32 = vld [vmem:[%s5155_s3 + $0xc8] ss:$16 sps:$4 sm:$0xff]   ;;  %v3401_v35 = vld [vmem:[%s5155_s3 + $0xec] ss:$16 sps:$4 sm:$0xff]   ;;  %v3402_v37 = vld [vmem:[%s5155_s3 + $0xe0] ss:$16 sps:$4 sm:$0xff]  }
   0xd   :  { %334 = vmatprep.subr.bf16.mxu1 %v3373_v12  ;;  %v3399_v36 = vld [vmem:[%s5155_s3 + $0xe8] ss:$16 sps:$4 sm:$0xff]   ;;  %v3405_v39 = vld [vmem:[%s5157_s5 + $0x4] ss:$40 sps:$4 sm:$0xff]  }
   0xe   :  { %3314 = vmatpush3.bf16.msra.mxu0 %v3354_v7  ;;  %v3408_v40 = vld [vmem:[%s5157_s5 + $0x504] ss:$40 sps:$4 sm:$0xff]  }
   0xf   :  { %369 = vmatprep.subr.bf16.mxu0 %v3359_v10 }
  0x10   :  { %335 = vmatpush1.bf16.msra.mxu1 %v3378_v16 }
  0x11   :  { %3316 = vmatmul.mubr.msk.bf16.vlgmr.msra.gmra.mrb[0].mxu0 %vm68_vm1, %v28_v13  ;;  %336 = vmatprep.subr.bf16.mxu1 %v3379_v17 }
  0x12   :  { %370 = vmatpush1.bf16.msra.mxu0 %v3357_v14  ;;  %401 = vmatprep.mubr.bf16.mxu0 %v3949_v38 }
  0x13   :  { %371 = vmatprep.subr.bf16.mxu0 %v3365_v15 }
  0x14   :  { %337 = vmatpush1.bf16.msra.mxu1 %v3384_v20 }
  0x15   :  { %338 = vmatprep.subr.bf16.mxu1 %v3385_v21 }
  0x16   :  { %372 = vmatpush1.bf16.msra.mxu0 %v3363_v18 }
  0x17   :  { %373 = vmatprep.subr.bf16.mxu0 %v3371_v19 }
  0x18   :  { %339 = vmatpush1.bf16.msra.mxu1 %v3390_v24 }
  0x19   :  { %340 = vmatprep.subr.bf16.mxu1 %v3391_v25 }
  0x1a   :  { %374 = vmatpush1.bf16.msra.mxu0 %v3369_v22 }
  0x1b   :  { %375 = vmatprep.subr.bf16.mxu0 %v3377_v23 }
  0x1c   :  { %341 = vmatpush1.bf16.msra.mxu1 %v3396_v33 }
  0x1d   :  { %342 = vmatprep.subr.bf16.mxu1 %v3397_v34 }
  0x1e   :  { %376 = vmatpush1.bf16.msra.mxu0 %v3375_v26 }
  0x1f   :  { %377 = vmatprep.subr.bf16.mxu0 %v3383_v27 }
  0x20   :  { %343 = vmatpush1.bf16.msra.mxu1 %v3402_v37 }
  0x21   :  { %2433 = vmatprep.subr.bf16.mxu1 %v3408_v40 }
  0x22   :  { %378 = vmatpush1.bf16.msra.mxu0 %v3381_v28 }
  0x23   :  { %379 = vmatprep.subr.bf16.mxu0 %v3389_v29 }
  0x26   :  { %380 = vmatpush1.bf16.msra.mxu0 %v3387_v30 }
  0x27   :  { %381 = vmatprep.subr.bf16.mxu0 %v3395_v31 }
  0x2a   :  { %382 = vmatpush1.bf16.msra.mxu0 %v3393_v32 }
  0x2b   :  { %383 = vmatprep.subr.bf16.mxu0 %v3401_v35 }
  0x2e   :  { %384 = vmatpush1.bf16.msra.mxu0 %v3399_v36 }
  0x2f   :  { %2392 = vmatprep.subr.bf16.mxu0 %v3405_v39 }
  0x30   :  { %12 = vsyncpa [#allocation3], 0  ;;  %v2924_v41 = vld [vmem:[%s5154_s2] ss:$0 sm:$0xff]  ;;  %v3411_v51 = vld [vmem:[%s5157_s5 + $0x54] ss:$40 sps:$4 sm:$0xff]  }
  0x31   :  { %v3403_v48 = vld [vmem:[%s5157_s5] ss:$40 sps:$4 sm:$0xff]   ;;  %v3414_v52 = vld [vmem:[%s5157_s5 + $0x554] ss:$40 sps:$4 sm:$0xff]   ;;  %v3409_v53 = vld [vmem:[%s5157_s5 + $0x50] ss:$40 sps:$4 sm:$0xff]  }
  0x32   :  { %v3406_v49 = vld [vmem:[%s5157_s5 + $0x500] ss:$40 sps:$4 sm:$0xff]   ;;  %v3412_v54 = vld [vmem:[%s5157_s5 + $0x550] ss:$40 sps:$4 sm:$0xff]   ;;  %v3417_v55 = vld [vmem:[%s5157_s5 + $0xa4] ss:$40 sps:$4 sm:$0xff]  }
  0x33   :  { %v3420_v56 = vld [vmem:[%s5157_s5 + $0x5a4] ss:$40 sps:$4 sm:$0xff]   ;;  %v3415_v57 = vld [vmem:[%s5157_s5 + $0xa0] ss:$40 sps:$4 sm:$0xff]   ;;  %v3423_v59 = vld [vmem:[%s5157_s5 + $0xf4] ss:$40 sps:$4 sm:$0xff]  }
  0x34   :  { %v3418_v58 = vld [vmem:[%s5157_s5 + $0x5a0] ss:$40 sps:$4 sm:$0xff]   ;;  %v3426_v60 = vld [vmem:[%s5157_s5 + $0x5f4] ss:$40 sps:$4 sm:$0xff]   ;;  %v3421_v61 = vld [vmem:[%s5157_s5 + $0xf0] ss:$40 sps:$4 sm:$0xff]  }
  0x35   :  { %v3424_v62 = vld [vmem:[%s5157_s5 + $0x5f0] ss:$40 sps:$4 sm:$0xff]   ;;  %v3429_v63 = vld [vmem:[%s5157_s5 + $0x144] ss:$40 sps:$4 sm:$0xff]   ;;  %v3427_v1 = vld [vmem:[%s5157_s5 + $0x140] ss:$40 sps:$4 sm:$0xff]  }
  0x36   :  { %v3432_v0 = vld [vmem:[%s5157_s5 + $0x644] ss:$40 sps:$4 sm:$0xff]   ;;  %v3430_v2 = vld [vmem:[%s5157_s5 + $0x640] ss:$40 sps:$4 sm:$0xff]   ;;  %v3435_v3 = vld [vmem:[%s5157_s5 + $0x194] ss:$40 sps:$4 sm:$0xff]  }
  0x37   :  { %v3438_v4 = vld [vmem:[%s5157_s5 + $0x694] ss:$40 sps:$4 sm:$0xff]   ;;  %v3433_v5 = vld [vmem:[%s5157_s5 + $0x190] ss:$40 sps:$4 sm:$0xff]   ;;  %v3441_v7 = vld [vmem:[%s5157_s5 + $0x1e4] ss:$40 sps:$4 sm:$0xff]  }
  0x38   :  { %v3436_v6 = vld [vmem:[%s5157_s5 + $0x690] ss:$40 sps:$4 sm:$0xff]   ;;  %v3444_v8 = vld [vmem:[%s5157_s5 + $0x6e4] ss:$40 sps:$4 sm:$0xff]   ;;  %v3439_v9 = vld [vmem:[%s5157_s5 + $0x1e0] ss:$40 sps:$4 sm:$0xff]  }
  0x39   :  { %v3442_v10 = vld [vmem:[%s5157_s5 + $0x6e0] ss:$40 sps:$4 sm:$0xff]   ;;  %v3447_v11 = vld [vmem:[%s5157_s5 + $0x234] ss:$40 sps:$4 sm:$0xff]   ;;  %v3445_v13 = vld [vmem:[%s5157_s5 + $0x230] ss:$40 sps:$4 sm:$0xff]  }
  0x3a   :  { %v3450_v12 = vld [vmem:[%s5157_s5 + $0x734] ss:$40 sps:$4 sm:$0xff]   ;;  %v3448_v14 = vld [vmem:[%s5157_s5 + $0x730] ss:$40 sps:$4 sm:$0xff]   ;;  %v3453_v15 = vld [vmem:[%s5157_s5 + $0x284] ss:$40 sps:$4 sm:$0xff]  }
  0x3b   :  { %v3456_v16 = vld [vmem:[%s5157_s5 + $0x784] ss:$40 sps:$4 sm:$0xff]   ;;  %v3451_v17 = vld [vmem:[%s5157_s5 + $0x280] ss:$40 sps:$4 sm:$0xff]   ;;  %v3459_v19 = vld [vmem:[%s5157_s5 + $0x2d4] ss:$40 sps:$4 sm:$0xff]  }
  0x3c   :  { %v3454_v18 = vld [vmem:[%s5157_s5 + $0x780] ss:$40 sps:$4 sm:$0xff]   ;;  %v3462_v20 = vld [vmem:[%s5157_s5 + $0x7d4] ss:$40 sps:$4 sm:$0xff]   ;;  %v3457_v21 = vld [vmem:[%s5157_s5 + $0x2d0] ss:$40 sps:$4 sm:$0xff]  }
  0x3d   :  { %v3460_v22 = vld [vmem:[%s5157_s5 + $0x7d0] ss:$40 sps:$4 sm:$0xff]   ;;  %v3465_v23 = vld [vmem:[%s5157_s5 + $0x324] ss:$40 sps:$4 sm:$0xff]   ;;  %v3463_v25 = vld [vmem:[%s5157_s5 + $0x320] ss:$40 sps:$4 sm:$0xff]  }
  0x3e   :  { %v3468_v24 = vld [vmem:[%s5157_s5 + $0x824] ss:$40 sps:$4 sm:$0xff]   ;;  %v3466_v26 = vld [vmem:[%s5157_s5 + $0x820] ss:$40 sps:$4 sm:$0xff]   ;;  %v3471_v27 = vld [vmem:[%s5157_s5 + $0x374] ss:$40 sps:$4 sm:$0xff]  }
  0x3f   :  { %v3474_v28 = vld [vmem:[%s5157_s5 + $0x874] ss:$40 sps:$4 sm:$0xff]   ;;  %v3469_v29 = vld [vmem:[%s5157_s5 + $0x370] ss:$40 sps:$4 sm:$0xff]   ;;  %v3477_v31 = vld [vmem:[%s5157_s5 + $0x3c4] ss:$40 sps:$4 sm:$0xff]  }
  0x40   :  { %v3472_v30 = vld [vmem:[%s5157_s5 + $0x870] ss:$40 sps:$4 sm:$0xff]   ;;  %v3480_v32 = vld [vmem:[%s5157_s5 + $0x8c4] ss:$40 sps:$4 sm:$0xff]   ;;  %v3475_v33 = vld [vmem:[%s5157_s5 + $0x3c0] ss:$40 sps:$4 sm:$0xff]  }
  0x41   :  { %v3478_v34 = vld [vmem:[%s5157_s5 + $0x8c0] ss:$40 sps:$4 sm:$0xff]   ;;  %v3483_v35 = vld [vmem:[%s5157_s5 + $0x414] ss:$40 sps:$4 sm:$0xff]   ;;  %v3481_v37 = vld [vmem:[%s5157_s5 + $0x410] ss:$40 sps:$4 sm:$0xff]  }
  0x42   :  { %v3486_v36 = vld [vmem:[%s5157_s5 + $0x914] ss:$40 sps:$4 sm:$0xff]   ;;  %v3484_v38 = vld [vmem:[%s5157_s5 + $0x910] ss:$40 sps:$4 sm:$0xff]   ;;  %v3489_v39 = vld [vmem:[%s5157_s5 + $0x464] ss:$40 sps:$4 sm:$0xff]  }
  0x43   :  { %v3492_v40 = vld [vmem:[%s5157_s5 + $0x964] ss:$40 sps:$4 sm:$0xff]   ;;  %vm2906_vm2 = vcmask 1043456   ;;  %vm2907_vm3 = vcmask 801796  }
  0x44   :  { %vm2908_vm4 = vmor %vm2907_vm3, %vm2906_vm2 }
  0xe4   :  { %v106_v42 = vpop.f32.mrb[0].mxu0 }
  0xe5   :  { %v107_v43 = vadd.f32 %v2924_v41, %v106_v42  ;;  %v3317_v44 = vpop.f32.mrb[1].mxu0  ;;  %v3487_v41 = vld [vmem:[%s5157_s5 + $0x460] ss:$40 sps:$4 sm:$0xff]  }
  0xe6   :  { %v109_v45 = vpop.f32.mrb[2].mxu0  ;;  %v3490_v42 = vld [vmem:[%s5157_s5 + $0x960] ss:$40 sps:$4 sm:$0xff]   ;;  %v3498_v44 = vld [vmem:[%s5157_s5 + $0x9b4] ss:$40 sps:$4 sm:$0xff]  }
  0xe7   :  { %v112_v46 = vmax.f32 %v107_v43, 0.0  ;;  %v3318_v47 = vpop.f32.mrb[3].mxu0  ;;  %v3495_v43 = vld [vmem:[%s5157_s5 + $0x4b4] ss:$40 sps:$4 sm:$0xff]   ;;  %v3493_v45 = vld [vmem:[%s5157_s5 + $0x4b0] ss:$40 sps:$4 sm:$0xff]  }
  0xe8   :  { %v3501_v47 = vld [vmem:[%s5157_s5 + $0xc] ss:$40 sps:$4 sm:$0xff]  }
  0xe9   :  { %v113_v50 = vpack.c.bf16 %v112_v46, %v112_v46  ;;  %v3496_v46 = vld [vmem:[%s5157_s5 + $0x9b0] ss:$40 sps:$4 sm:$0xff]  }
  0xeb   :  { %361 = vmatmul.mubr.bf16.vlgmr.msra.gmra.mrb[0].mxu1 %v113_v50  ;;  %402 = vmatmul.mubr.bf16.vlgmr.msra.gmra.mrb[4].mxu0 %v113_v50 }
  0xec   :  { %2393 = vmatpush1.bf16.msra.mxu0 %v3403_v48  ;;  %2434 = vmatpush1.bf16.msra.mxu1 %v3406_v49  ;;  %v3504_v48 = vld [vmem:[%s5157_s5 + $0x14] ss:$40 sps:$4 sm:$0xff]   ;;  %v148_v49 = vlaneseq }
  0xed   :  { %2394 = vmatprep.subr.bf16.mxu0 %v3411_v51  ;;  %2435 = vmatprep.subr.bf16.mxu1 %v3414_v52 }
  0xee   :  { %v4303_v50 = vshrl.u32 %v148_v49, 7  ;;  %v3550_v49 = vld [vmem:[%s5157_s5 + $0x290] ss:$40 sps:$4 sm:$0xff]  }
  0xf0   :  { %2395 = vmatpush1.bf16.msra.mxu0 %v3409_v53  ;;  %2436 = vmatpush1.bf16.msra.mxu1 %v3412_v54  ;;  %v4306_v51 = vsub.s32 0, %v4303_v50  ;;  %v158_v52 = vsub.s32 2, %v4303_v50  ;;  %v146_v53 = vld [vmem:[%s5156_s4] sm:$0xf]  ;;  %v4313_v54 = vsub.s32 1, %v4303_v50 }
  0xf1   :  { %2396 = vmatprep.subr.bf16.mxu0 %v3417_v55  ;;  %2437 = vmatprep.subr.bf16.mxu1 %v3420_v56  ;;  %v162_v55 = vsub.s32 3, %v4303_v50 }
  0xf2   :  { %v151_v56 = vrot.slane %v146_v53, %v4306_v51 }
  0xf4   :  { %2397 = vmatpush1.bf16.msra.mxu0 %v3415_v57  ;;  %2438 = vmatpush1.bf16.msra.mxu1 %v3418_v58  ;;  %v159_v57 = vrot.slane %v146_v53, %v158_v52  ;;  %v155_v58 = vrot.slane %v146_v53, %v4313_v54 }
  0xf5   :  { %2398 = vmatprep.subr.bf16.mxu0 %v3423_v59  ;;  %2439 = vmatprep.subr.bf16.mxu1 %v3426_v60  ;;  %v163_v59 = vrot.slane %v146_v53, %v162_v55  ;;  %v3555_v53 = vld [vmem:[%s5157_s5 + $0x2dc] ss:$40 sps:$4 sm:$0xff]  }
  0xf8   :  { %2399 = vmatpush1.bf16.msra.mxu0 %v3421_v61  ;;  %2440 = vmatpush1.bf16.msra.mxu1 %v3424_v62 }
  0xf9   :  { %2400 = vmatprep.subr.bf16.mxu0 %v3429_v63  ;;  %2441 = vmatprep.subr.bf16.mxu1 %v3432_v0 }
  0xfc   :  { %2401 = vmatpush1.bf16.msra.mxu0 %v3427_v1  ;;  %2442 = vmatpush1.bf16.msra.mxu1 %v3430_v2 }
  0xfd   :  { %2402 = vmatprep.subr.bf16.mxu0 %v3435_v3  ;;  %2443 = vmatprep.subr.bf16.mxu1 %v3438_v4 }
 0x100   :  { %2403 = vmatpush1.bf16.msra.mxu0 %v3433_v5  ;;  %2444 = vmatpush1.bf16.msra.mxu1 %v3436_v6 }
 0x101   :  { %2404 = vmatprep.subr.bf16.mxu0 %v3441_v7  ;;  %2445 = vmatprep.subr.bf16.mxu1 %v3444_v8 }
 0x104   :  { %2405 = vmatpush1.bf16.msra.mxu0 %v3439_v9  ;;  %2446 = vmatpush1.bf16.msra.mxu1 %v3442_v10 }
 0x105   :  { %2406 = vmatprep.subr.bf16.mxu0 %v3447_v11  ;;  %2447 = vmatprep.subr.bf16.mxu1 %v3450_v12 }
 0x108   :  { %2407 = vmatpush1.bf16.msra.mxu0 %v3445_v13  ;;  %2448 = vmatpush1.bf16.msra.mxu1 %v3448_v14  ;;  %v3499_v14 = vld [vmem:[%s5157_s5 + $0x8] ss:$40 sps:$4 sm:$0xff]  }
 0x109   :  { %2408 = vmatprep.subr.bf16.mxu0 %v3453_v15  ;;  %2449 = vmatprep.subr.bf16.mxu1 %v3456_v16  ;;  %v3502_v15 = vld [vmem:[%s5157_s5 + $0x10] ss:$40 sps:$4 sm:$0xff]  }
 0x10c   :  { %2409 = vmatpush1.bf16.msra.mxu0 %v3451_v17  ;;  %2450 = vmatpush1.bf16.msra.mxu1 %v3454_v18  ;;  %v3507_v18 = vld [vmem:[%s5157_s5 + $0x5c] ss:$40 sps:$4 sm:$0xff]  }
 0x10d   :  { %2410 = vmatprep.subr.bf16.mxu0 %v3459_v19  ;;  %2451 = vmatprep.subr.bf16.mxu1 %v3462_v20  ;;  %v3510_v19 = vld [vmem:[%s5157_s5 + $0x64] ss:$40 sps:$4 sm:$0xff]   ;;  %v3505_v20 = vld [vmem:[%s5157_s5 + $0x58] ss:$40 sps:$4 sm:$0xff]  }
 0x110   :  { %2411 = vmatpush1.bf16.msra.mxu0 %v3457_v21  ;;  %2452 = vmatpush1.bf16.msra.mxu1 %v3460_v22  ;;  %v3508_v21 = vld [vmem:[%s5157_s5 + $0x60] ss:$40 sps:$4 sm:$0xff]   ;;  %v3513_v22 = vld [vmem:[%s5157_s5 + $0xac] ss:$40 sps:$4 sm:$0xff]  }
 0x111   :  { %2412 = vmatprep.subr.bf16.mxu0 %v3465_v23  ;;  %2453 = vmatprep.subr.bf16.mxu1 %v3468_v24  ;;  %v3516_v23 = vld [vmem:[%s5157_s5 + $0xb4] ss:$40 sps:$4 sm:$0xff]   ;;  %v3511_v24 = vld [vmem:[%s5157_s5 + $0xa8] ss:$40 sps:$4 sm:$0xff]  }
 0x114   :  { %2413 = vmatpush1.bf16.msra.mxu0 %v3463_v25  ;;  %2454 = vmatpush1.bf16.msra.mxu1 %v3466_v26  ;;  %v3514_v25 = vld [vmem:[%s5157_s5 + $0xb0] ss:$40 sps:$4 sm:$0xff]   ;;  %v3519_v26 = vld [vmem:[%s5157_s5 + $0xfc] ss:$40 sps:$4 sm:$0xff]  }
 0x115   :  { %2414 = vmatprep.subr.bf16.mxu0 %v3471_v27  ;;  %2455 = vmatprep.subr.bf16.mxu1 %v3474_v28  ;;  %v3522_v27 = vld [vmem:[%s5157_s5 + $0x104] ss:$40 sps:$4 sm:$0xff]   ;;  %v3517_v28 = vld [vmem:[%s5157_s5 + $0xf8] ss:$40 sps:$4 sm:$0xff]  }
 0x118   :  { %2415 = vmatpush1.bf16.msra.mxu0 %v3469_v29  ;;  %2456 = vmatpush1.bf16.msra.mxu1 %v3472_v30  ;;  %v3520_v29 = vld [vmem:[%s5157_s5 + $0x100] ss:$40 sps:$4 sm:$0xff]   ;;  %v3525_v30 = vld [vmem:[%s5157_s5 + $0x14c] ss:$40 sps:$4 sm:$0xff]  }
 0x119   :  { %2416 = vmatprep.subr.bf16.mxu0 %v3477_v31  ;;  %2457 = vmatprep.subr.bf16.mxu1 %v3480_v32  ;;  %v3528_v31 = vld [vmem:[%s5157_s5 + $0x154] ss:$40 sps:$4 sm:$0xff]   ;;  %v3523_v32 = vld [vmem:[%s5157_s5 + $0x148] ss:$40 sps:$4 sm:$0xff]  }
 0x11c   :  { %2417 = vmatpush1.bf16.msra.mxu0 %v3475_v33  ;;  %2458 = vmatpush1.bf16.msra.mxu1 %v3478_v34  ;;  %v3526_v33 = vld [vmem:[%s5157_s5 + $0x150] ss:$40 sps:$4 sm:$0xff]   ;;  %v3531_v34 = vld [vmem:[%s5157_s5 + $0x19c] ss:$40 sps:$4 sm:$0xff]  }
 0x11d   :  { %2418 = vmatprep.subr.bf16.mxu0 %v3483_v35  ;;  %2459 = vmatprep.subr.bf16.mxu1 %v3486_v36  ;;  %v3534_v35 = vld [vmem:[%s5157_s5 + $0x1a4] ss:$40 sps:$4 sm:$0xff]   ;;  %v3529_v36 = vld [vmem:[%s5157_s5 + $0x198] ss:$40 sps:$4 sm:$0xff]  }
 0x120   :  { %2419 = vmatpush1.bf16.msra.mxu0 %v3481_v37  ;;  %2460 = vmatpush1.bf16.msra.mxu1 %v3484_v38  ;;  %v3532_v37 = vld [vmem:[%s5157_s5 + $0x1a0] ss:$40 sps:$4 sm:$0xff]   ;;  %v3537_v38 = vld [vmem:[%s5157_s5 + $0x1ec] ss:$40 sps:$4 sm:$0xff]  }
 0x121   :  { %2420 = vmatprep.subr.bf16.mxu0 %v3489_v39  ;;  %2461 = vmatprep.subr.bf16.mxu1 %v3492_v40  ;;  %v3540_v39 = vld [vmem:[%s5157_s5 + $0x1f4] ss:$40 sps:$4 sm:$0xff]   ;;  %v3535_v40 = vld [vmem:[%s5157_s5 + $0x1e8] ss:$40 sps:$4 sm:$0xff]  }
 0x124   :  { %2421 = vmatpush1.bf16.msra.mxu0 %v3487_v41  ;;  %2462 = vmatpush1.bf16.msra.mxu1 %v3490_v42  ;;  %v3538_v41 = vld [vmem:[%s5157_s5 + $0x1f0] ss:$40 sps:$4 sm:$0xff]   ;;  %v3543_v42 = vld [vmem:[%s5157_s5 + $0x23c] ss:$40 sps:$4 sm:$0xff]  }
 0x125   :  { %2422 = vmatprep.subr.bf16.mxu0 %v3495_v43  ;;  %2463 = vmatprep.subr.bf16.mxu1 %v3498_v44  ;;  %v3546_v43 = vld [vmem:[%s5157_s5 + $0x244] ss:$40 sps:$4 sm:$0xff]   ;;  %v3541_v44 = vld [vmem:[%s5157_s5 + $0x238] ss:$40 sps:$4 sm:$0xff]  }
 0x128   :  { %2423 = vmatpush1.bf16.msra.mxu0 %v3493_v45  ;;  %2464 = vmatpush1.bf16.msra.mxu1 %v3496_v46  ;;  %v3544_v45 = vld [vmem:[%s5157_s5 + $0x240] ss:$40 sps:$4 sm:$0xff]   ;;  %v3549_v46 = vld [vmem:[%s5157_s5 + $0x28c] ss:$40 sps:$4 sm:$0xff]  }
 0x129   :  { %2474 = vmatprep.subr.bf16.mxu0 %v3501_v47  ;;  %2556 = vmatprep.subr.bf16.mxu1 %v3504_v48  ;;  %v3552_v47 = vld [vmem:[%s5157_s5 + $0x294] ss:$40 sps:$4 sm:$0xff]   ;;  %v3547_v48 = vld [vmem:[%s5157_s5 + $0x288] ss:$40 sps:$4 sm:$0xff]  }
 0x1be   :  { %v362_v60 = vpop.f32.mrb[0].mxu1  ;;  %v403_v61 = vpop.f32.mrb[4].mxu0 }
 0x1bf   :  { %v363_v62 = vadd.f32 %v362_v60, %v151_v56  ;;  %v404_v63 = vadd.f32 %v403_v61, %v159_v57  ;;  %v364_v0 = vpop.f32.mrb[1].mxu1  ;;  %v405_v1 = vpop.f32.mrb[5].mxu0  ;;  %v3558_v56 = vld [vmem:[%s5157_s5 + $0x2e4] ss:$40 sps:$4 sm:$0xff]   ;;  %v3553_v57 = vld [vmem:[%s5157_s5 + $0x2d8] ss:$40 sps:$4 sm:$0xff]  }
 0x1c0   :  { %v365_v2 = vadd.f32 %v364_v0, %v155_v58  ;;  %v406_v3 = vadd.f32 %v405_v1, %v163_v59  ;;  %v366_v4 = vpop.f32.mrb[2].mxu1  ;;  %v407_v5 = vpop.f32.mrb[6].mxu0  ;;  %v3556_v58 = vld [vmem:[%s5157_s5 + $0x2e0] ss:$40 sps:$4 sm:$0xff]   ;;  %v3561_v59 = vld [vmem:[%s5157_s5 + $0x32c] ss:$40 sps:$4 sm:$0xff]  }
 0x1c1   :  { %v410_v6 = vmax.f32 %v363_v62, 0.0  ;;  %v412_v7 = vmax.f32 %v404_v63, 0.0  ;;  %v367_v8 = vpop.f32.mrb[3].mxu1  ;;  %v408_v9 = vpop.f32.mrb[7].mxu0  ;;  %v3564_v60 = vld [vmem:[%s5157_s5 + $0x334] ss:$40 sps:$4 sm:$0xff]  }
 0x1c2   :  { %v411_v10 = vmax.f32 %v365_v2, 0.0  ;;  %v413_v11 = vmax.f32 %v406_v3, 0.0  ;;  %v3559_v61 = vld [vmem:[%s5157_s5 + $0x328] ss:$40 sps:$4 sm:$0xff]   ;;  %v3567_v63 = vld [vmem:[%s5157_s5 + $0x37c] ss:$40 sps:$4 sm:$0xff]  }
 0x1c3   :  { %v4332_v16 = vpack.c.bf16 %v410_v6, %v410_v6  ;;  %v4334_v17 = vpack.c.bf16 %v412_v7, %v412_v7  ;;  %v3562_v62 = vld [vmem:[%s5157_s5 + $0x330] ss:$40 sps:$4 sm:$0xff]   ;;  %v3570_v0 = vld [vmem:[%s5157_s5 + $0x384] ss:$40 sps:$4 sm:$0xff]   ;;  %v3568_v2 = vld [vmem:[%s5157_s5 + $0x380] ss:$40 sps:$4 sm:$0xff]  }
 0x1c4   :  { %v4322_v12 = vpack.c.bf16 %v411_v10, %v411_v10  ;;  %v4324_v13 = vpack.c.bf16 %v413_v11, %v413_v11  ;;  %v3565_v1 = vld [vmem:[%s5157_s5 + $0x378] ss:$40 sps:$4 sm:$0xff]   ;;  %v3573_v3 = vld [vmem:[%s5157_s5 + $0x3cc] ss:$40 sps:$4 sm:$0xff]   ;;  %v3571_v5 = vld [vmem:[%s5157_s5 + $0x3c8] ss:$40 sps:$4 sm:$0xff]  }
 0x1c5   :  { %v3576_v4 = vld [vmem:[%s5157_s5 + $0x3d4] ss:$40 sps:$4 sm:$0xff]   ;;  %v3574_v6 = vld [vmem:[%s5157_s5 + $0x3d0] ss:$40 sps:$4 sm:$0xff]   ;;  %v3582_v8 = vld [vmem:[%s5157_s5 + $0x424] ss:$40 sps:$4 sm:$0xff]  }
 0x1c6   :  { %2424 = vmatprep.mubr.bf16.mxu0 %v4322_v12  ;;  %2465 = vmatprep.mubr.bf16.mxu1 %v4324_v13  ;;  %v3579_v7 = vld [vmem:[%s5157_s5 + $0x41c] ss:$40 sps:$4 sm:$0xff]   ;;  %v3577_v9 = vld [vmem:[%s5157_s5 + $0x418] ss:$40 sps:$4 sm:$0xff]   ;;  %v3585_v11 = vld [vmem:[%s5157_s5 + $0x46c] ss:$40 sps:$4 sm:$0xff]  }
 0x1c7   :  { %2425 = vmatmul.mubr.bf16.vlgmr.msra.gmra.mrb[8].mxu0 %v4332_v16  ;;  %2466 = vmatmul.mubr.bf16.vlgmr.msra.gmra.mrb[4].mxu1 %v4334_v17  ;;  %v3580_v10 = vld [vmem:[%s5157_s5 + $0x420] ss:$40 sps:$4 sm:$0xff]  }
 0x1c8   :  { %2475 = vmatpush1.bf16.msra.mxu0 %v3499_v14  ;;  %2557 = vmatpush1.bf16.msra.mxu1 %v3502_v15  ;;  %v3588_v14 = vld [vmem:[%s5157_s5 + $0x474] ss:$40 sps:$4 sm:$0xff]   ;;  %v3583_v15 = vld [vmem:[%s5157_s5 + $0x468] ss:$40 sps:$4 sm:$0xff]  }
 0x1c9   :  { %2506 = vmatprep.mubr.bf16.mxu0 %v4322_v12  ;;  %2588 = vmatprep.mubr.bf16.mxu1 %v4322_v12 }
 0x1ca   :  { %2476 = vmatprep.subr.bf16.mxu0 %v3507_v18  ;;  %2558 = vmatprep.subr.bf16.mxu1 %v3510_v19  ;;  %v3586_v18 = vld [vmem:[%s5157_s5 + $0x470] ss:$40 sps:$4 sm:$0xff]   ;;  %v3591_v19 = vld [vmem:[%s5157_s5 + $0x4bc] ss:$40 sps:$4 sm:$0xff]  }
 0x1cc   :  { %2477 = vmatpush1.bf16.msra.mxu0 %v3505_v20  ;;  %2559 = vmatpush1.bf16.msra.mxu1 %v3508_v21  ;;  %v3594_v20 = vld [vmem:[%s5157_s5 + $0x4c4] ss:$40 sps:$4 sm:$0xff]   ;;  %v3589_v21 = vld [vmem:[%s5157_s5 + $0x4b8] ss:$40 sps:$4 sm:$0xff]  }
 0x1cd   :  { %2478 = vmatprep.subr.bf16.mxu0 %v3513_v22  ;;  %2560 = vmatprep.subr.bf16.mxu1 %v3516_v23  ;;  %v3592_v22 = vld [vmem:[%s5157_s5 + $0x4c0] ss:$40 sps:$4 sm:$0xff]   ;;  %v3597_v23 = vld [vmem:[%s5157_s5 + $0x50c] ss:$40 sps:$4 sm:$0xff]  }
 0x1d0   :  { %2479 = vmatpush1.bf16.msra.mxu0 %v3511_v24  ;;  %2561 = vmatpush1.bf16.msra.mxu1 %v3514_v25  ;;  %v3600_v24 = vld [vmem:[%s5157_s5 + $0x514] ss:$40 sps:$4 sm:$0xff]   ;;  %v3595_v25 = vld [vmem:[%s5157_s5 + $0x508] ss:$40 sps:$4 sm:$0xff]  }
 0x1d1   :  { %2480 = vmatprep.subr.bf16.mxu0 %v3519_v26  ;;  %2562 = vmatprep.subr.bf16.mxu1 %v3522_v27  ;;  %v3598_v26 = vld [vmem:[%s5157_s5 + $0x510] ss:$40 sps:$4 sm:$0xff]   ;;  %v3603_v27 = vld [vmem:[%s5157_s5 + $0x55c] ss:$40 sps:$4 sm:$0xff]  }
 0x1d4   :  { %2481 = vmatpush1.bf16.msra.mxu0 %v3517_v28  ;;  %2563 = vmatpush1.bf16.msra.mxu1 %v3520_v29  ;;  %v3606_v28 = vld [vmem:[%s5157_s5 + $0x564] ss:$40 sps:$4 sm:$0xff]   ;;  %v3601_v29 = vld [vmem:[%s5157_s5 + $0x558] ss:$40 sps:$4 sm:$0xff]  }
 0x1d5   :  { %2482 = vmatprep.subr.bf16.mxu0 %v3525_v30  ;;  %2564 = vmatprep.subr.bf16.mxu1 %v3528_v31  ;;  %v3604_v30 = vld [vmem:[%s5157_s5 + $0x560] ss:$40 sps:$4 sm:$0xff]   ;;  %v3609_v31 = vld [vmem:[%s5157_s5 + $0x5ac] ss:$40 sps:$4 sm:$0xff]  }
 0x1d8   :  { %2483 = vmatpush1.bf16.msra.mxu0 %v3523_v32  ;;  %2565 = vmatpush1.bf16.msra.mxu1 %v3526_v33  ;;  %v3612_v32 = vld [vmem:[%s5157_s5 + $0x5b4] ss:$40 sps:$4 sm:$0xff]   ;;  %v3607_v33 = vld [vmem:[%s5157_s5 + $0x5a8] ss:$40 sps:$4 sm:$0xff]  }
 0x1d9   :  { %2484 = vmatprep.subr.bf16.mxu0 %v3531_v34  ;;  %2566 = vmatprep.subr.bf16.mxu1 %v3534_v35  ;;  %v3610_v34 = vld [vmem:[%s5157_s5 + $0x5b0] ss:$40 sps:$4 sm:$0xff]   ;;  %v3615_v35 = vld [vmem:[%s5157_s5 + $0x5fc] ss:$40 sps:$4 sm:$0xff]  }
 0x1dc   :  { %2485 = vmatpush1.bf16.msra.mxu0 %v3529_v36  ;;  %2567 = vmatpush1.bf16.msra.mxu1 %v3532_v37  ;;  %v3618_v36 = vld [vmem:[%s5157_s5 + $0x604] ss:$40 sps:$4 sm:$0xff]   ;;  %v3613_v37 = vld [vmem:[%s5157_s5 + $0x5f8] ss:$40 sps:$4 sm:$0xff]  }
 0x1dd   :  { %2486 = vmatprep.subr.bf16.mxu0 %v3537_v38  ;;  %2568 = vmatprep.subr.bf16.mxu1 %v3540_v39  ;;  %v3616_v38 = vld [vmem:[%s5157_s5 + $0x600] ss:$40 sps:$4 sm:$0xff]   ;;  %v3621_v39 = vld [vmem:[%s5157_s5 + $0x64c] ss:$40 sps:$4 sm:$0xff]  }
 0x1e0   :  { %2487 = vmatpush1.bf16.msra.mxu0 %v3535_v40  ;;  %2569 = vmatpush1.bf16.msra.mxu1 %v3538_v41  ;;  %v3624_v40 = vld [vmem:[%s5157_s5 + $0x654] ss:$40 sps:$4 sm:$0xff]   ;;  %v3619_v41 = vld [vmem:[%s5157_s5 + $0x648] ss:$40 sps:$4 sm:$0xff]  }
 0x1e1   :  { %2488 = vmatprep.subr.bf16.mxu0 %v3543_v42  ;;  %2570 = vmatprep.subr.bf16.mxu1 %v3546_v43  ;;  %v3622_v42 = vld [vmem:[%s5157_s5 + $0x650] ss:$40 sps:$4 sm:$0xff]   ;;  %v3627_v43 = vld [vmem:[%s5157_s5 + $0x69c] ss:$40 sps:$4 sm:$0xff]  }
 0x1e4   :  { %2489 = vmatpush1.bf16.msra.mxu0 %v3541_v44  ;;  %2571 = vmatpush1.bf16.msra.mxu1 %v3544_v45  ;;  %v3630_v44 = vld [vmem:[%s5157_s5 + $0x6a4] ss:$40 sps:$4 sm:$0xff]   ;;  %v3625_v45 = vld [vmem:[%s5157_s5 + $0x698] ss:$40 sps:$4 sm:$0xff]  }
 0x1e5   :  { %2490 = vmatprep.subr.bf16.mxu0 %v3549_v46  ;;  %2572 = vmatprep.subr.bf16.mxu1 %v3552_v47  ;;  %v3628_v46 = vld [vmem:[%s5157_s5 + $0x6a0] ss:$40 sps:$4 sm:$0xff]   ;;  %v3633_v47 = vld [vmem:[%s5157_s5 + $0x6ec] ss:$40 sps:$4 sm:$0xff]  }
 0x1e8   :  { %2491 = vmatpush1.bf16.msra.mxu0 %v3547_v48  ;;  %2573 = vmatpush1.bf16.msra.mxu1 %v3550_v49  ;;  %v3636_v48 = vld [vmem:[%s5157_s5 + $0x6f4] ss:$40 sps:$4 sm:$0xff]   ;;  %v3631_v49 = vld [vmem:[%s5157_s5 + $0x6e8] ss:$40 sps:$4 sm:$0xff]  }
 0x1e9   :  { %2492 = vmatprep.subr.bf16.mxu0 %v3555_v53  ;;  %2574 = vmatprep.subr.bf16.mxu1 %v3558_v56  ;;  %v3634_v53 = vld [vmem:[%s5157_s5 + $0x6f0] ss:$40 sps:$4 sm:$0xff]   ;;  %v3639_v56 = vld [vmem:[%s5157_s5 + $0x73c] ss:$40 sps:$4 sm:$0xff]  }
 0x1ec   :  { %2493 = vmatpush1.bf16.msra.mxu0 %v3553_v57  ;;  %2575 = vmatpush1.bf16.msra.mxu1 %v3556_v58  ;;  %v3642_v57 = vld [vmem:[%s5157_s5 + $0x744] ss:$40 sps:$4 sm:$0xff]   ;;  %v3637_v58 = vld [vmem:[%s5157_s5 + $0x738] ss:$40 sps:$4 sm:$0xff]  }
 0x1ed   :  { %2494 = vmatprep.subr.bf16.mxu0 %v3561_v59  ;;  %2576 = vmatprep.subr.bf16.mxu1 %v3564_v60  ;;  %v3640_v59 = vld [vmem:[%s5157_s5 + $0x740] ss:$40 sps:$4 sm:$0xff]   ;;  %v3645_v60 = vld [vmem:[%s5157_s5 + $0x78c] ss:$40 sps:$4 sm:$0xff]  }
 0x1f0   :  { %2495 = vmatpush1.bf16.msra.mxu0 %v3559_v61  ;;  %2577 = vmatpush1.bf16.msra.mxu1 %v3562_v62  ;;  %v3648_v61 = vld [vmem:[%s5157_s5 + $0x794] ss:$40 sps:$4 sm:$0xff]   ;;  %v3643_v62 = vld [vmem:[%s5157_s5 + $0x788] ss:$40 sps:$4 sm:$0xff]  }
 0x1f1   :  { %2496 = vmatprep.subr.bf16.mxu0 %v3567_v63  ;;  %2578 = vmatprep.subr.bf16.mxu1 %v3570_v0  ;;  %v3646_v63 = vld [vmem:[%s5157_s5 + $0x790] ss:$40 sps:$4 sm:$0xff]   ;;  %v3651_v0 = vld [vmem:[%s5157_s5 + $0x7dc] ss:$40 sps:$4 sm:$0xff]  }
 0x1f4   :  { %2497 = vmatpush1.bf16.msra.mxu0 %v3565_v1  ;;  %2579 = vmatpush1.bf16.msra.mxu1 %v3568_v2  ;;  %v3654_v1 = vld [vmem:[%s5157_s5 + $0x7e4] ss:$40 sps:$4 sm:$0xff]   ;;  %v3649_v2 = vld [vmem:[%s5157_s5 + $0x7d8] ss:$40 sps:$4 sm:$0xff]  }
 0x1f5   :  { %2498 = vmatprep.subr.bf16.mxu0 %v3573_v3  ;;  %2580 = vmatprep.subr.bf16.mxu1 %v3576_v4  ;;  %v3652_v3 = vld [vmem:[%s5157_s5 + $0x7e0] ss:$40 sps:$4 sm:$0xff]   ;;  %v3657_v4 = vld [vmem:[%s5157_s5 + $0x82c] ss:$40 sps:$4 sm:$0xff]  }
 0x1f8   :  { %2499 = vmatpush1.bf16.msra.mxu0 %v3571_v5  ;;  %2581 = vmatpush1.bf16.msra.mxu1 %v3574_v6  ;;  %v3660_v5 = vld [vmem:[%s5157_s5 + $0x834] ss:$40 sps:$4 sm:$0xff]   ;;  %v3655_v6 = vld [vmem:[%s5157_s5 + $0x828] ss:$40 sps:$4 sm:$0xff]  }
 0x1f9   :  { %2500 = vmatprep.subr.bf16.mxu0 %v3579_v7  ;;  %2582 = vmatprep.subr.bf16.mxu1 %v3582_v8  ;;  %v3658_v7 = vld [vmem:[%s5157_s5 + $0x830] ss:$40 sps:$4 sm:$0xff]   ;;  %v3663_v8 = vld [vmem:[%s5157_s5 + $0x87c] ss:$40 sps:$4 sm:$0xff]  }
 0x1fc   :  { %2501 = vmatpush1.bf16.msra.mxu0 %v3577_v9  ;;  %2583 = vmatpush1.bf16.msra.mxu1 %v3580_v10  ;;  %v3666_v9 = vld [vmem:[%s5157_s5 + $0x884] ss:$40 sps:$4 sm:$0xff]   ;;  %v3661_v10 = vld [vmem:[%s5157_s5 + $0x878] ss:$40 sps:$4 sm:$0xff]  }
 0x1fd   :  { %2502 = vmatprep.subr.bf16.mxu0 %v3585_v11  ;;  %2584 = vmatprep.subr.bf16.mxu1 %v3588_v14  ;;  %v3664_v11 = vld [vmem:[%s5157_s5 + $0x880] ss:$40 sps:$4 sm:$0xff]   ;;  %v3669_v14 = vld [vmem:[%s5157_s5 + $0x8cc] ss:$40 sps:$4 sm:$0xff]  }
 0x200   :  { %2503 = vmatpush1.bf16.msra.mxu0 %v3583_v15  ;;  %2585 = vmatpush1.bf16.msra.mxu1 %v3586_v18  ;;  %v3672_v15 = vld [vmem:[%s5157_s5 + $0x8d4] ss:$40 sps:$4 sm:$0xff]   ;;  %v3667_v18 = vld [vmem:[%s5157_s5 + $0x8c8] ss:$40 sps:$4 sm:$0xff]  }
 0x201   :  { %2504 = vmatprep.subr.bf16.mxu0 %v3591_v19  ;;  %2586 = vmatprep.subr.bf16.mxu1 %v3594_v20  ;;  %v3670_v19 = vld [vmem:[%s5157_s5 + $0x8d0] ss:$40 sps:$4 sm:$0xff]   ;;  %v3675_v20 = vld [vmem:[%s5157_s5 + $0x91c] ss:$40 sps:$4 sm:$0xff]  }
 0x204   :  { %2505 = vmatpush1.bf16.msra.mxu0 %v3589_v21  ;;  %2587 = vmatpush1.bf16.msra.mxu1 %v3592_v22  ;;  %v3678_v21 = vld [vmem:[%s5157_s5 + $0x924] ss:$40 sps:$4 sm:$0xff]   ;;  %v3673_v22 = vld [vmem:[%s5157_s5 + $0x918] ss:$40 sps:$4 sm:$0xff]  }
 0x205   :  { %2515 = vmatprep.subr.bf16.mxu0 %v3597_v23  ;;  %2597 = vmatprep.subr.bf16.mxu1 %v3600_v24  ;;  %v3676_v23 = vld [vmem:[%s5157_s5 + $0x920] ss:$40 sps:$4 sm:$0xff]   ;;  %v3681_v24 = vld [vmem:[%s5157_s5 + $0x96c] ss:$40 sps:$4 sm:$0xff]  }
 0x207   :  { %2507 = vmatmul.mubr.bf16.vlgmr.msra.gmra.mrb[12].mxu0 %v4332_v16  ;;  %2589 = vmatmul.mubr.bf16.vlgmr.msra.gmra.mrb[8].mxu1 %v4332_v16 }
 0x208   :  { %2516 = vmatpush1.bf16.msra.mxu0 %v3595_v25  ;;  %2547 = vmatprep.mubr.bf16.mxu0 %v4324_v13  ;;  %v3684_v25 = vld [vmem:[%s5157_s5 + $0x974] ss:$40 sps:$4 sm:$0xff]  }
 0x209   :  { %2598 = vmatpush1.bf16.msra.mxu1 %v3598_v26  ;;  %2629 = vmatprep.mubr.bf16.mxu1 %v4324_v13  ;;  %v3679_v26 = vld [vmem:[%s5157_s5 + $0x968] ss:$40 sps:$4 sm:$0xff]  }
 0x20a   :  { %2517 = vmatprep.subr.bf16.mxu0 %v3603_v27  ;;  %2599 = vmatprep.subr.bf16.mxu1 %v3606_v28  ;;  %v3682_v27 = vld [vmem:[%s5157_s5 + $0x970] ss:$40 sps:$4 sm:$0xff]   ;;  %v3687_v28 = vld [vmem:[%s5157_s5 + $0x9bc] ss:$40 sps:$4 sm:$0xff]  }
 0x20c   :  { %2518 = vmatpush1.bf16.msra.mxu0 %v3601_v29  ;;  %v3690_v29 = vld [vmem:[%s5157_s5 + $0x9c4] ss:$40 sps:$4 sm:$0xff]  }
 0x20d   :  { %2600 = vmatpush1.bf16.msra.mxu1 %v3604_v30  ;;  %2519 = vmatprep.subr.bf16.mxu0 %v3609_v31  ;;  %v3685_v30 = vld [vmem:[%s5157_s5 + $0x9b8] ss:$40 sps:$4 sm:$0xff]  }
 0x20e   :  { %2601 = vmatprep.subr.bf16.mxu1 %v3612_v32  ;;  %v3688_v31 = vld [vmem:[%s5157_s5 + $0x9c0] ss:$40 sps:$4 sm:$0xff]   ;;  %v3693_v32 = vld [vmem:[%s5157_s5 + $0x1c] ss:$40 sps:$4 sm:$0xff]  }
 0x210   :  { %2520 = vmatpush1.bf16.msra.mxu0 %v3607_v33  ;;  %v3696_v33 = vld [vmem:[%s5157_s5 + $0x24] ss:$40 sps:$4 sm:$0xff]  }
 0x211   :  { %2602 = vmatpush1.bf16.msra.mxu1 %v3610_v34  ;;  %2521 = vmatprep.subr.bf16.mxu0 %v3615_v35  ;;  %v3691_v34 = vld [vmem:[%s5157_s5 + $0x18] ss:$40 sps:$4 sm:$0xff]  }
 0x212   :  { %2603 = vmatprep.subr.bf16.mxu1 %v3618_v36  ;;  %v3694_v35 = vld [vmem:[%s5157_s5 + $0x20] ss:$40 sps:$4 sm:$0xff]   ;;  %v3699_v36 = vld [vmem:[%s5157_s5 + $0x6c] ss:$40 sps:$4 sm:$0xff]  }
 0x214   :  { %2522 = vmatpush1.bf16.msra.mxu0 %v3613_v37  ;;  %v3702_v37 = vld [vmem:[%s5157_s5 + $0x74] ss:$40 sps:$4 sm:$0xff]  }
 0x215   :  { %2604 = vmatpush1.bf16.msra.mxu1 %v3616_v38  ;;  %2523 = vmatprep.subr.bf16.mxu0 %v3621_v39  ;;  %v3697_v38 = vld [vmem:[%s5157_s5 + $0x68] ss:$40 sps:$4 sm:$0xff]  }
 0x216   :  { %2605 = vmatprep.subr.bf16.mxu1 %v3624_v40  ;;  %v3700_v39 = vld [vmem:[%s5157_s5 + $0x70] ss:$40 sps:$4 sm:$0xff]   ;;  %v3705_v40 = vld [vmem:[%s5157_s5 + $0xbc] ss:$40 sps:$4 sm:$0xff]  }
 0x218   :  { %2524 = vmatpush1.bf16.msra.mxu0 %v3619_v41  ;;  %v3708_v41 = vld [vmem:[%s5157_s5 + $0xc4] ss:$40 sps:$4 sm:$0xff]  }
 0x219   :  { %2606 = vmatpush1.bf16.msra.mxu1 %v3622_v42  ;;  %2525 = vmatprep.subr.bf16.mxu0 %v3627_v43  ;;  %v3703_v42 = vld [vmem:[%s5157_s5 + $0xb8] ss:$40 sps:$4 sm:$0xff]  }
 0x21a   :  { %2607 = vmatprep.subr.bf16.mxu1 %v3630_v44  ;;  %v3706_v43 = vld [vmem:[%s5157_s5 + $0xc0] ss:$40 sps:$4 sm:$0xff]   ;;  %v3714_v44 = vld [vmem:[%s5157_s5 + $0x114] ss:$40 sps:$4 sm:$0xff]  }
 0x21c   :  { %2526 = vmatpush1.bf16.msra.mxu0 %v3625_v45  ;;  %v3709_v45 = vld [vmem:[%s5157_s5 + $0x108] ss:$40 sps:$4 sm:$0xff]  }
 0x21d   :  { %2608 = vmatpush1.bf16.msra.mxu1 %v3628_v46  ;;  %2527 = vmatprep.subr.bf16.mxu0 %v3633_v47  ;;  %v3712_v46 = vld [vmem:[%s5157_s5 + $0x110] ss:$40 sps:$4 sm:$0xff]   ;;  %v3717_v47 = vld [vmem:[%s5157_s5 + $0x15c] ss:$40 sps:$4 sm:$0xff]  }
 0x21e   :  { %2609 = vmatprep.subr.bf16.mxu1 %v3636_v48  ;;  %v3720_v48 = vld [vmem:[%s5157_s5 + $0x164] ss:$40 sps:$4 sm:$0xff]  }
 0x220   :  { %2528 = vmatpush1.bf16.msra.mxu0 %v3631_v49  ;;  %v3715_v49 = vld [vmem:[%s5157_s5 + $0x158] ss:$40 sps:$4 sm:$0xff]  }
 0x221   :  { %2610 = vmatpush1.bf16.msra.mxu1 %v3634_v53  ;;  %2529 = vmatprep.subr.bf16.mxu0 %v3639_v56  ;;  %v3718_v53 = vld [vmem:[%s5157_s5 + $0x160] ss:$40 sps:$4 sm:$0xff]   ;;  %v3723_v56 = vld [vmem:[%s5157_s5 + $0x1ac] ss:$40 sps:$4 sm:$0xff]  }
 0x222   :  { %2611 = vmatprep.subr.bf16.mxu1 %v3642_v57  ;;  %v3726_v57 = vld [vmem:[%s5157_s5 + $0x1b4] ss:$40 sps:$4 sm:$0xff]  }
 0x224   :  { %2530 = vmatpush1.bf16.msra.mxu0 %v3637_v58  ;;  %v3721_v58 = vld [vmem:[%s5157_s5 + $0x1a8] ss:$40 sps:$4 sm:$0xff]  }
 0x225   :  { %2612 = vmatpush1.bf16.msra.mxu1 %v3640_v59  ;;  %2531 = vmatprep.subr.bf16.mxu0 %v3645_v60  ;;  %v3724_v59 = vld [vmem:[%s5157_s5 + $0x1b0] ss:$40 sps:$4 sm:$0xff]   ;;  %v3729_v60 = vld [vmem:[%s5157_s5 + $0x1fc] ss:$40 sps:$4 sm:$0xff]  }
 0x226   :  { %2613 = vmatprep.subr.bf16.mxu1 %v3648_v61  ;;  %v3732_v61 = vld [vmem:[%s5157_s5 + $0x204] ss:$40 sps:$4 sm:$0xff]  }
 0x228   :  { %2532 = vmatpush1.bf16.msra.mxu0 %v3643_v62  ;;  %v3727_v62 = vld [vmem:[%s5157_s5 + $0x1f8] ss:$40 sps:$4 sm:$0xff]  }
 0x229   :  { %2614 = vmatpush1.bf16.msra.mxu1 %v3646_v63  ;;  %2533 = vmatprep.subr.bf16.mxu0 %v3651_v0  ;;  %v3730_v63 = vld [vmem:[%s5157_s5 + $0x200] ss:$40 sps:$4 sm:$0xff]   ;;  %v3735_v0 = vld [vmem:[%s5157_s5 + $0x24c] ss:$40 sps:$4 sm:$0xff]  }
 0x22a   :  { %2615 = vmatprep.subr.bf16.mxu1 %v3654_v1  ;;  %v3738_v1 = vld [vmem:[%s5157_s5 + $0x254] ss:$40 sps:$4 sm:$0xff]  }
 0x22c   :  { %2534 = vmatpush1.bf16.msra.mxu0 %v3649_v2  ;;  %v3733_v2 = vld [vmem:[%s5157_s5 + $0x248] ss:$40 sps:$4 sm:$0xff]  }
 0x22d   :  { %2616 = vmatpush1.bf16.msra.mxu1 %v3652_v3  ;;  %2535 = vmatprep.subr.bf16.mxu0 %v3657_v4  ;;  %v3736_v3 = vld [vmem:[%s5157_s5 + $0x250] ss:$40 sps:$4 sm:$0xff]   ;;  %v3741_v4 = vld [vmem:[%s5157_s5 + $0x29c] ss:$40 sps:$4 sm:$0xff]  }
 0x22e   :  { %2617 = vmatprep.subr.bf16.mxu1 %v3660_v5  ;;  %v3744_v5 = vld [vmem:[%s5157_s5 + $0x2a4] ss:$40 sps:$4 sm:$0xff]  }
 0x230   :  { %2536 = vmatpush1.bf16.msra.mxu0 %v3655_v6  ;;  %v3739_v6 = vld [vmem:[%s5157_s5 + $0x298] ss:$40 sps:$4 sm:$0xff]  }
 0x231   :  { %2618 = vmatpush1.bf16.msra.mxu1 %v3658_v7  ;;  %2537 = vmatprep.subr.bf16.mxu0 %v3663_v8  ;;  %v3742_v7 = vld [vmem:[%s5157_s5 + $0x2a0] ss:$40 sps:$4 sm:$0xff]   ;;  %v3747_v8 = vld [vmem:[%s5157_s5 + $0x2ec] ss:$40 sps:$4 sm:$0xff]  }
 0x232   :  { %2619 = vmatprep.subr.bf16.mxu1 %v3666_v9  ;;  %v3750_v9 = vld [vmem:[%s5157_s5 + $0x2f4] ss:$40 sps:$4 sm:$0xff]  }
 0x234   :  { %2538 = vmatpush1.bf16.msra.mxu0 %v3661_v10  ;;  %v3745_v10 = vld [vmem:[%s5157_s5 + $0x2e8] ss:$40 sps:$4 sm:$0xff]  }
 0x235   :  { %2620 = vmatpush1.bf16.msra.mxu1 %v3664_v11  ;;  %2539 = vmatprep.subr.bf16.mxu0 %v3669_v14  ;;  %v3748_v11 = vld [vmem:[%s5157_s5 + $0x2f0] ss:$40 sps:$4 sm:$0xff]   ;;  %v3753_v14 = vld [vmem:[%s5157_s5 + $0x33c] ss:$40 sps:$4 sm:$0xff]  }
 0x236   :  { %2621 = vmatprep.subr.bf16.mxu1 %v3672_v15  ;;  %v3756_v15 = vld [vmem:[%s5157_s5 + $0x344] ss:$40 sps:$4 sm:$0xff]  }
 0x238   :  { %2540 = vmatpush1.bf16.msra.mxu0 %v3667_v18  ;;  %v3751_v18 = vld [vmem:[%s5157_s5 + $0x338] ss:$40 sps:$4 sm:$0xff]  }
 0x239   :  { %2622 = vmatpush1.bf16.msra.mxu1 %v3670_v19  ;;  %2541 = vmatprep.subr.bf16.mxu0 %v3675_v20  ;;  %v3754_v19 = vld [vmem:[%s5157_s5 + $0x340] ss:$40 sps:$4 sm:$0xff]   ;;  %v3759_v20 = vld [vmem:[%s5157_s5 + $0x38c] ss:$40 sps:$4 sm:$0xff]  }
 0x23a   :  { %2623 = vmatprep.subr.bf16.mxu1 %v3678_v21  ;;  %v3762_v21 = vld [vmem:[%s5157_s5 + $0x394] ss:$40 sps:$4 sm:$0xff]  }
 0x23c   :  { %2542 = vmatpush1.bf16.msra.mxu0 %v3673_v22  ;;  %v3757_v22 = vld [vmem:[%s5157_s5 + $0x388] ss:$40 sps:$4 sm:$0xff]  }
 0x23d   :  { %2624 = vmatpush1.bf16.msra.mxu1 %v3676_v23  ;;  %2543 = vmatprep.subr.bf16.mxu0 %v3681_v24  ;;  %v3760_v23 = vld [vmem:[%s5157_s5 + $0x390] ss:$40 sps:$4 sm:$0xff]   ;;  %v3765_v24 = vld [vmem:[%s5157_s5 + $0x3dc] ss:$40 sps:$4 sm:$0xff]  }
 0x23e   :  { %2625 = vmatprep.subr.bf16.mxu1 %v3684_v25  ;;  %v3768_v25 = vld [vmem:[%s5157_s5 + $0x3e4] ss:$40 sps:$4 sm:$0xff]  }
 0x240   :  { %2544 = vmatpush1.bf16.msra.mxu0 %v3679_v26  ;;  %v3763_v26 = vld [vmem:[%s5157_s5 + $0x3d8] ss:$40 sps:$4 sm:$0xff]  }
 0x241   :  { %2626 = vmatpush1.bf16.msra.mxu1 %v3682_v27  ;;  %2545 = vmatprep.subr.bf16.mxu0 %v3687_v28  ;;  %v3766_v27 = vld [vmem:[%s5157_s5 + $0x3e0] ss:$40 sps:$4 sm:$0xff]   ;;  %v3771_v28 = vld [vmem:[%s5157_s5 + $0x42c] ss:$40 sps:$4 sm:$0xff]  }
 0x242   :  { %2627 = vmatprep.subr.bf16.mxu1 %v3690_v29  ;;  %v3774_v29 = vld [vmem:[%s5157_s5 + $0x434] ss:$40 sps:$4 sm:$0xff]  }
 0x244   :  { %2546 = vmatpush1.bf16.msra.mxu0 %v3685_v30  ;;  %v3769_v30 = vld [vmem:[%s5157_s5 + $0x428] ss:$40 sps:$4 sm:$0xff]  }
 0x245   :  { %2628 = vmatpush1.bf16.msra.mxu1 %v3688_v31  ;;  %2638 = vmatprep.subr.bf16.mxu0 %v3693_v32  ;;  %v3772_v31 = vld [vmem:[%s5157_s5 + $0x430] ss:$40 sps:$4 sm:$0xff]   ;;  %v3777_v32 = vld [vmem:[%s5157_s5 + $0x47c] ss:$40 sps:$4 sm:$0xff]  }
 0x246   :  { %2720 = vmatprep.subr.bf16.mxu1 %v3696_v33  ;;  %v3780_v33 = vld [vmem:[%s5157_s5 + $0x484] ss:$40 sps:$4 sm:$0xff]  }
 0x247   :  { %2548 = vmatmul.mubr.bf16.vlgmr.msra.gmra.mrb[12].mxu0 %v4334_v17 }
 0x248   :  { %2630 = vmatmul.mubr.bf16.vlgmr.msra.gmra.mrb[8].mxu1 %v4334_v17  ;;  %2639 = vmatpush1.bf16.msra.mxu0 %v3691_v34  ;;  %v3775_v34 = vld [vmem:[%s5157_s5 + $0x478] ss:$40 sps:$4 sm:$0xff]  }
 0x249   :  { %2670 = vmatprep.mubr.bf16.mxu0 %v4322_v12  ;;  %2721 = vmatpush1.bf16.msra.mxu1 %v3694_v35  ;;  %v3778_v35 = vld [vmem:[%s5157_s5 + $0x480] ss:$40 sps:$4 sm:$0xff]  }
 0x24a   :  { %2752 = vmatprep.mubr.bf16.mxu1 %v4322_v12  ;;  %2640 = vmatprep.subr.bf16.mxu0 %v3699_v36  ;;  %v3711_v12 = vld [vmem:[%s5157_s5 + $0x10c] ss:$40 sps:$4 sm:$0xff]  }
 0x24b   :  { %2722 = vmatprep.subr.bf16.mxu1 %v3702_v37  ;;  %v3783_v36 = vld [vmem:[%s5157_s5 + $0x4cc] ss:$40 sps:$4 sm:$0xff]  }
 0x24c   :  { %2641 = vmatpush1.bf16.msra.mxu0 %v3697_v38  ;;  %v3786_v37 = vld [vmem:[%s5157_s5 + $0x4d4] ss:$40 sps:$4 sm:$0xff]   ;;  %v3781_v38 = vld [vmem:[%s5157_s5 + $0x4c8] ss:$40 sps:$4 sm:$0xff]  }
 0x24d   :  { %2723 = vmatpush1.bf16.msra.mxu1 %v3700_v39  ;;  %2642 = vmatprep.subr.bf16.mxu0 %v3705_v40  ;;  %v3784_v39 = vld [vmem:[%s5157_s5 + $0x4d0] ss:$40 sps:$4 sm:$0xff]   ;;  %v3789_v40 = vld [vmem:[%s5157_s5 + $0x51c] ss:$40 sps:$4 sm:$0xff]  }
 0x24e   :  { %2724 = vmatprep.subr.bf16.mxu1 %v3708_v41  ;;  %v3792_v41 = vld [vmem:[%s5157_s5 + $0x524] ss:$40 sps:$4 sm:$0xff]  }
 0x250   :  { %2643 = vmatpush1.bf16.msra.mxu0 %v3703_v42  ;;  %v3787_v42 = vld [vmem:[%s5157_s5 + $0x518] ss:$40 sps:$4 sm:$0xff]  }
 0x251   :  { %2725 = vmatpush1.bf16.msra.mxu1 %v3706_v43  ;;  %2644 = vmatprep.subr.bf16.mxu0 %v3711_v12  ;;  %v3790_v43 = vld [vmem:[%s5157_s5 + $0x520] ss:$40 sps:$4 sm:$0xff]   ;;  %v3795_v12 = vld [vmem:[%s5157_s5 + $0x56c] ss:$40 sps:$4 sm:$0xff]  }
 0x252   :  { %2726 = vmatprep.subr.bf16.mxu1 %v3714_v44  ;;  %v3798_v44 = vld [vmem:[%s5157_s5 + $0x574] ss:$40 sps:$4 sm:$0xff]  }
 0x254   :  { %2645 = vmatpush1.bf16.msra.mxu0 %v3709_v45  ;;  %v3793_v45 = vld [vmem:[%s5157_s5 + $0x568] ss:$40 sps:$4 sm:$0xff]  }
 0x255   :  { %2727 = vmatpush1.bf16.msra.mxu1 %v3712_v46  ;;  %2646 = vmatprep.subr.bf16.mxu0 %v3717_v47  ;;  %v3796_v46 = vld [vmem:[%s5157_s5 + $0x570] ss:$40 sps:$4 sm:$0xff]   ;;  %v3801_v47 = vld [vmem:[%s5157_s5 + $0x5bc] ss:$40 sps:$4 sm:$0xff]  }
 0x256   :  { %2728 = vmatprep.subr.bf16.mxu1 %v3720_v48  ;;  %v3799_v48 = vld [vmem:[%s5157_s5 + $0x5b8] ss:$40 sps:$4 sm:$0xff]  }
 0x258   :  { %2647 = vmatpush1.bf16.msra.mxu0 %v3715_v49  ;;  %v3802_v49 = vld [vmem:[%s5157_s5 + $0x5c0] ss:$40 sps:$4 sm:$0xff]  }
 0x259   :  { %2729 = vmatpush1.bf16.msra.mxu1 %v3718_v53  ;;  %2648 = vmatprep.subr.bf16.mxu0 %v3723_v56  ;;  %v3810_v53 = vld [vmem:[%s5157_s5 + $0x614] ss:$40 sps:$4 sm:$0xff]   ;;  %v3805_v56 = vld [vmem:[%s5157_s5 + $0x608] ss:$40 sps:$4 sm:$0xff]  }
 0x25a   :  { %2730 = vmatprep.subr.bf16.mxu1 %v3726_v57  ;;  %v3808_v57 = vld [vmem:[%s5157_s5 + $0x610] ss:$40 sps:$4 sm:$0xff]  }
 0x25c   :  { %2649 = vmatpush1.bf16.msra.mxu0 %v3721_v58  ;;  %v3813_v58 = vld [vmem:[%s5157_s5 + $0x65c] ss:$40 sps:$4 sm:$0xff]  }
 0x25d   :  { %2731 = vmatpush1.bf16.msra.mxu1 %v3724_v59  ;;  %2650 = vmatprep.subr.bf16.mxu0 %v3729_v60  ;;  %v3816_v59 = vld [vmem:[%s5157_s5 + $0x664] ss:$40 sps:$4 sm:$0xff]   ;;  %v3811_v60 = vld [vmem:[%s5157_s5 + $0x658] ss:$40 sps:$4 sm:$0xff]  }
 0x25e   :  { %2732 = vmatprep.subr.bf16.mxu1 %v3732_v61  ;;  %v4978_v61 = vld [vmem:[%s5158_s6] sm:$0xff] }
 0x260   :  { %2651 = vmatpush1.bf16.msra.mxu0 %v3727_v62  ;;  %v3814_v62 = vld [vmem:[%s5157_s5 + $0x660] ss:$40 sps:$4 sm:$0xff]  }
 0x261   :  { %2733 = vmatpush1.bf16.msra.mxu1 %v3730_v63  ;;  %2652 = vmatprep.subr.bf16.mxu0 %v3735_v0  ;;  %v3819_v63 = vld [vmem:[%s5157_s5 + $0x6ac] ss:$40 sps:$4 sm:$0xff]  }
 0x262   :  { %2734 = vmatprep.subr.bf16.mxu1 %v3738_v1  ;;  %v3822_v0 = vld [vmem:[%s5157_s5 + $0x6b4] ss:$40 sps:$4 sm:$0xff]   ;;  %v745_v1 = vrot.slane %v4978_v61, %v4306_v51 }
 0x264   :  { %2653 = vmatpush1.bf16.msra.mxu0 %v3733_v2  ;;  %v3817_v2 = vld [vmem:[%s5157_s5 + $0x6a8] ss:$40 sps:$4 sm:$0xff]  }
 0x265   :  { %2735 = vmatpush1.bf16.msra.mxu1 %v3736_v3  ;;  %2654 = vmatprep.subr.bf16.mxu0 %v3741_v4  ;;  %v749_v3 = vrot.slane %v4978_v61, %v4313_v54  ;;  %v3820_v4 = vld [vmem:[%s5157_s5 + $0x6b0] ss:$40 sps:$4 sm:$0xff]  }
 0x266   :  { %2736 = vmatprep.subr.bf16.mxu1 %v3744_v5  ;;  %v3825_v5 = vld [vmem:[%s5157_s5 + $0x6fc] ss:$40 sps:$4 sm:$0xff]  }
 0x268   :  { %2655 = vmatpush1.bf16.msra.mxu0 %v3739_v6 }
 0x269   :  { %2737 = vmatpush1.bf16.msra.mxu1 %v3742_v7  ;;  %2656 = vmatprep.subr.bf16.mxu0 %v3747_v8  ;;  %v3828_v8 = vld [vmem:[%s5157_s5 + $0x704] ss:$40 sps:$4 sm:$0xff]  }
 0x26a   :  { %2738 = vmatprep.subr.bf16.mxu1 %v3750_v9 }
 0x26c   :  { %2657 = vmatpush1.bf16.msra.mxu0 %v3745_v10 }
 0x26d   :  { %2739 = vmatpush1.bf16.msra.mxu1 %v3748_v11  ;;  %2658 = vmatprep.subr.bf16.mxu0 %v3753_v14 }
 0x26e   :  { %2740 = vmatprep.subr.bf16.mxu1 %v3756_v15 }
 0x270   :  { %2659 = vmatpush1.bf16.msra.mxu0 %v3751_v18 }
 0x271   :  { %2741 = vmatpush1.bf16.msra.mxu1 %v3754_v19  ;;  %2660 = vmatprep.subr.bf16.mxu0 %v3759_v20  ;;  %v3823_v19 = vld [vmem:[%s5157_s5 + $0x6f8] ss:$40 sps:$4 sm:$0xff]  }
 0x272   :  { %2742 = vmatprep.subr.bf16.mxu1 %v3762_v21 }
 0x274   :  { %2661 = vmatpush1.bf16.msra.mxu0 %v3757_v22 }
 0x275   :  { %2743 = vmatpush1.bf16.msra.mxu1 %v3760_v23  ;;  %2662 = vmatprep.subr.bf16.mxu0 %v3765_v24  ;;  %v3826_v23 = vld [vmem:[%s5157_s5 + $0x700] ss:$40 sps:$4 sm:$0xff]   ;;  %v3831_v24 = vld [vmem:[%s5157_s5 + $0x74c] ss:$40 sps:$4 sm:$0xff]  }
 0x276   :  { %2744 = vmatprep.subr.bf16.mxu1 %v3768_v25 }
 0x278   :  { %2663 = vmatpush1.bf16.msra.mxu0 %v3763_v26  ;;  %v3834_v26 = vld [vmem:[%s5157_s5 + $0x754] ss:$40 sps:$4 sm:$0xff]  }
 0x279   :  { %2745 = vmatpush1.bf16.msra.mxu1 %v3766_v27  ;;  %2664 = vmatprep.subr.bf16.mxu0 %v3771_v28 }
 0x27a   :  { %2746 = vmatprep.subr.bf16.mxu1 %v3774_v29  ;;  %v3829_v29 = vld [vmem:[%s5157_s5 + $0x748] ss:$40 sps:$4 sm:$0xff]  }
 0x27c   :  { %2665 = vmatpush1.bf16.msra.mxu0 %v3769_v30  ;;  %v3832_v30 = vld [vmem:[%s5157_s5 + $0x750] ss:$40 sps:$4 sm:$0xff]  }
 0x27d   :  { %2747 = vmatpush1.bf16.msra.mxu1 %v3772_v31  ;;  %2666 = vmatprep.subr.bf16.mxu0 %v3777_v32  ;;  %v3837_v31 = vld [vmem:[%s5157_s5 + $0x79c] ss:$40 sps:$4 sm:$0xff]  }
 0x27e   :  { %2748 = vmatprep.subr.bf16.mxu1 %v3780_v33  ;;  %v3840_v32 = vld [vmem:[%s5157_s5 + $0x7a4] ss:$40 sps:$4 sm:$0xff]   ;;  %v3835_v33 = vld [vmem:[%s5157_s5 + $0x798] ss:$40 sps:$4 sm:$0xff]  }
 0x280   :  { %2667 = vmatpush1.bf16.msra.mxu0 %v3775_v34  ;;  %v3838_v34 = vld [vmem:[%s5157_s5 + $0x7a0] ss:$40 sps:$4 sm:$0xff]  }
 0x281   :  { %2749 = vmatpush1.bf16.msra.mxu1 %v3778_v35  ;;  %2668 = vmatprep.subr.bf16.mxu0 %v3783_v36  ;;  %v3843_v35 = vld [vmem:[%s5157_s5 + $0x7ec] ss:$40 sps:$4 sm:$0xff]  }
 0x282   :  { %2750 = vmatprep.subr.bf16.mxu1 %v3786_v37  ;;  %v3846_v36 = vld [vmem:[%s5157_s5 + $0x7f4] ss:$40 sps:$4 sm:$0xff]   ;;  %v3841_v37 = vld [vmem:[%s5157_s5 + $0x7e8] ss:$40 sps:$4 sm:$0xff]  }
 0x284   :  { %2669 = vmatpush1.bf16.msra.mxu0 %v3781_v38  ;;  %v3844_v38 = vld [vmem:[%s5157_s5 + $0x7f0] ss:$40 sps:$4 sm:$0xff]  }
 0x285   :  { %2751 = vmatpush1.bf16.msra.mxu1 %v3784_v39  ;;  %2679 = vmatprep.subr.bf16.mxu0 %v3789_v40  ;;  %v3849_v39 = vld [vmem:[%s5157_s5 + $0x83c] ss:$40 sps:$4 sm:$0xff]  }
 0x286   :  { %2761 = vmatprep.subr.bf16.mxu1 %v3792_v41  ;;  %v3852_v40 = vld [vmem:[%s5157_s5 + $0x844] ss:$40 sps:$4 sm:$0xff]  }
 0x287   :  { %2671 = vmatmul.mubr.bf16.vlgmr.msra.gmra.mrb[16].mxu0 %v4332_v16 }
 0x288   :  { %2753 = vmatmul.mubr.bf16.vlgmr.msra.gmra.mrb[12].mxu1 %v4332_v16  ;;  %2680 = vmatpush1.bf16.msra.mxu0 %v3787_v42  ;;  %v3804_v16 = vld [vmem:[%s5157_s5 + $0x5c4] ss:$40 sps:$4 sm:$0xff]  }
 0x289   :  { %2711 = vmatprep.mubr.bf16.mxu0 %v4324_v13  ;;  %2762 = vmatpush1.bf16.msra.mxu1 %v3790_v43 }
 0x28a   :  { %2793 = vmatprep.mubr.bf16.mxu1 %v4324_v13  ;;  %2681 = vmatprep.subr.bf16.mxu0 %v3795_v12  ;;  %v3807_v13 = vld [vmem:[%s5157_s5 + $0x60c] ss:$40 sps:$4 sm:$0xff]   ;;  %v3847_v12 = vld [vmem:[%s5157_s5 + $0x838] ss:$40 sps:$4 sm:$0xff]  }
 0x28b   :  { %2763 = vmatprep.subr.bf16.mxu1 %v3798_v44 }
 0x28c   :  { %2682 = vmatpush1.bf16.msra.mxu0 %v3793_v45  ;;  %v3850_v45 = vld [vmem:[%s5157_s5 + $0x840] ss:$40 sps:$4 sm:$0xff]  }
 0x28d   :  { %2764 = vmatpush1.bf16.msra.mxu1 %v3796_v46  ;;  %2683 = vmatprep.subr.bf16.mxu0 %v3801_v47  ;;  %v3855_v46 = vld [vmem:[%s5157_s5 + $0x88c] ss:$40 sps:$4 sm:$0xff]  }
 0x28e   :  { %2765 = vmatprep.subr.bf16.mxu1 %v3804_v16  ;;  %v3858_v47 = vld [vmem:[%s5157_s5 + $0x894] ss:$40 sps:$4 sm:$0xff]   ;;  %v3853_v16 = vld [vmem:[%s5157_s5 + $0x888] ss:$40 sps:$4 sm:$0xff]  }
 0x290   :  { %2684 = vmatpush1.bf16.msra.mxu0 %v3799_v48  ;;  %v3856_v48 = vld [vmem:[%s5157_s5 + $0x890] ss:$40 sps:$4 sm:$0xff]  }
 0x291   :  { %2766 = vmatpush1.bf16.msra.mxu1 %v3802_v49  ;;  %2685 = vmatprep.subr.bf16.mxu0 %v3807_v13  ;;  %v3861_v49 = vld [vmem:[%s5157_s5 + $0x8dc] ss:$40 sps:$4 sm:$0xff]  }
 0x292   :  { %2767 = vmatprep.subr.bf16.mxu1 %v3810_v53  ;;  %v3864_v13 = vld [vmem:[%s5157_s5 + $0x8e4] ss:$40 sps:$4 sm:$0xff]   ;;  %v3859_v53 = vld [vmem:[%s5157_s5 + $0x8d8] ss:$40 sps:$4 sm:$0xff]  }
 0x294   :  { %2686 = vmatpush1.bf16.msra.mxu0 %v3805_v56  ;;  %v3862_v56 = vld [vmem:[%s5157_s5 + $0x8e0] ss:$40 sps:$4 sm:$0xff]  }
 0x295   :  { %2768 = vmatpush1.bf16.msra.mxu1 %v3808_v57  ;;  %2687 = vmatprep.subr.bf16.mxu0 %v3813_v58  ;;  %v3867_v57 = vld [vmem:[%s5157_s5 + $0x92c] ss:$40 sps:$4 sm:$0xff]  }
 0x296   :  { %2769 = vmatprep.subr.bf16.mxu1 %v3816_v59  ;;  %v3870_v58 = vld [vmem:[%s5157_s5 + $0x934] ss:$40 sps:$4 sm:$0xff]  }
 0x298   :  { %2688 = vmatpush1.bf16.msra.mxu0 %v3811_v60  ;;  %v3865_v60 = vld [vmem:[%s5157_s5 + $0x928] ss:$40 sps:$4 sm:$0xff]  }
 0x299   :  { %2770 = vmatpush1.bf16.msra.mxu1 %v3814_v62  ;;  %2689 = vmatprep.subr.bf16.mxu0 %v3819_v63  ;;  %v3868_v63 = vld [vmem:[%s5157_s5 + $0x930] ss:$40 sps:$4 sm:$0xff]  }
 0x29a   :  { %v2426_v6 = vpop.f32.mrb[8].mxu0  ;;  %v2467_v7 = vpop.f32.mrb[4].mxu1  ;;  %2771 = vmatprep.subr.bf16.mxu1 %v3822_v0  ;;  %v3873_v0 = vld [vmem:[%s5157_s5 + $0x97c] ss:$40 sps:$4 sm:$0xff]  }
 0x29b   :  { %v2427_v9 = vadd.f32 %v2426_v6, %v745_v1  ;;  %v2428_v10 = vpop.f32.mrb[9].mxu0  ;;  %v2469_v11 = vpop.f32.mrb[5].mxu1  ;;  %v3876_v1 = vld [vmem:[%s5157_s5 + $0x984] ss:$40 sps:$4 sm:$0xff]   ;;  %v3882_v6 = vld [vmem:[%s5157_s5 + $0x9d4] ss:$40 sps:$4 sm:$0xff]  }
 0x29c   :  { %v2429_v14 = vadd.f32 %v2428_v10, %v749_v3  ;;  %2690 = vmatpush1.bf16.msra.mxu0 %v3817_v2  ;;  %v2430_v15 = vpop.f32.mrb[10].mxu0  ;;  %v2471_v18 = vpop.f32.mrb[6].mxu1  ;;  %v3871_v3 = vld [vmem:[%s5157_s5 + $0x978] ss:$40 sps:$4 sm:$0xff]   ;;  %v764_v10 = vsub.s32 5, %v4303_v50 }
 0x29d   :  { %v2468_v20 = vadd.f32 %v2467_v7, %v2427_v9  ;;  %2772 = vmatpush1.bf16.msra.mxu1 %v3820_v4  ;;  %v2431_v21 = vpop.f32.mrb[11].mxu0  ;;  %v2472_v22 = vpop.f32.mrb[7].mxu1  ;;  %2691 = vmatprep.subr.bf16.mxu0 %v3825_v5  ;;  %v3874_v4 = vld [vmem:[%s5157_s5 + $0x980] ss:$40 sps:$4 sm:$0xff]   ;;  %v3879_v5 = vld [vmem:[%s5157_s5 + $0x9cc] ss:$40 sps:$4 sm:$0xff]   ;;  %v757_v15 = vrot.slane %v4978_v61, %v162_v55 }
 0x29e   :  { %v2470_v25 = vadd.f32 %v2469_v11, %v2429_v14  ;;  %2773 = vmatprep.subr.bf16.mxu1 %v3828_v8  ;;  %v3877_v7 = vld [vmem:[%s5157_s5 + $0x9c8] ss:$40 sps:$4 sm:$0xff]   ;;  %v760_v9 = vsub.s32 4, %v4303_v50  ;;  %v753_v11 = vrot.slane %v4978_v61, %v158_v52  ;;  %v765_v18 = vrot.slane %v4978_v61, %v764_v10 }
 0x29f   :  { %v3282_v27 = vmul.f32 -1.442695, %v2468_v20  ;;  %v3880_v8 = vld [vmem:[%s5157_s5 + $0x9d0] ss:$40 sps:$4 sm:$0xff]  }
 0x2a0   :  { %v3283_v28 = vmul.f32 -1.442695, %v2470_v25  ;;  %2692 = vmatpush1.bf16.msra.mxu0 %v3823_v19  ;;  %v761_v14 = vrot.slane %v4978_v61, %v760_v9 }
 0x2a1   :  { %3883 = vpow2.f32 %v3282_v27  ;;  %2774 = vmatpush1.bf16.msra.mxu1 %v3826_v23  ;;  %2693 = vmatprep.subr.bf16.mxu0 %v3831_v24 }
 0x2a2   :  { %3885 = vpow2.f32 %v3283_v28  ;;  %2775 = vmatprep.subr.bf16.mxu1 %v3834_v26 }
 0x2a4   :  { %2694 = vmatpush1.bf16.msra.mxu0 %v3829_v29 }
 0x2a5   :  { %2776 = vmatpush1.bf16.msra.mxu1 %v3832_v30  ;;  %2695 = vmatprep.subr.bf16.mxu0 %v3837_v31 }
 0x2a6   :  { %2777 = vmatprep.subr.bf16.mxu1 %v3840_v32 }
 0x2a8   :  { %2696 = vmatpush1.bf16.msra.mxu0 %v3835_v33 }
 0x2a9   :  { %2778 = vmatpush1.bf16.msra.mxu1 %v3838_v34  ;;  %2697 = vmatprep.subr.bf16.mxu0 %v3843_v35 }
 0x2aa   :  { %2779 = vmatprep.subr.bf16.mxu1 %v3846_v36 }
 0x2ab   :  { %v3884_v41 = vpop.eup %3883 }
 0x2ac   :  { %v3886_v42 = vpop.eup %3885  ;;  %v2832_v43 = vadd.f32 1.0, %v3884_v41  ;;  %2698 = vmatpush1.bf16.msra.mxu0 %v3841_v37 }
 0x2ad   :  { %v2833_v44 = vadd.f32 1.0, %v3886_v42  ;;  %2780 = vmatpush1.bf16.msra.mxu1 %v3844_v38  ;;  %2699 = vmatprep.subr.bf16.mxu0 %v3849_v39 }
 0x2ae   :  { %3887 = vrcp.f32 %v2832_v43  ;;  %2781 = vmatprep.subr.bf16.mxu1 %v3852_v40 }
 0x2af   :  { %3889 = vrcp.f32 %v2833_v44 }
 0x2b0   :  { %2700 = vmatpush1.bf16.msra.mxu0 %v3847_v12 }
 0x2b1   :  { %2782 = vmatpush1.bf16.msra.mxu1 %v3850_v45  ;;  %2701 = vmatprep.subr.bf16.mxu0 %v3855_v46  ;;  %v768_v45 = vsub.s32 6, %v4303_v50  ;;  %v772_v46 = vsub.s32 7, %v4303_v50 }
 0x2b2   :  { %2783 = vmatprep.subr.bf16.mxu1 %v3858_v47  ;;  %v739_v47 = vld [vmem:[%s5158_s6 + $0x8] sm:$0x3]  ;;  %s3950_s6 = smov [#allocation2]  }
 0x2b3   :  { %s2916_s30 = sshll.u32 %s3950_s6, 4  ;;  %s2917_s30 = int_to_ptr.vmem [resolvable:$true] %s2916_s30 }
 0x2b4   :  { %2702 = vmatpush1.bf16.msra.mxu0 %v3853_v16  ;;  %v769_v16 = vrot.slane %v4978_v61, %v768_v45  ;;  %s3923_s8 = scalar_lea.vmem %s2917_s30, 640  ;;  %p3928_p1 = scmp.lt.s32.totalorder %s2917_s30, %s2917_s30 }
 0x2b5   :  { %2784 = vmatpush1.bf16.msra.mxu1 %v3856_v48  ;;  %2703 = vmatprep.subr.bf16.mxu0 %v3861_v49  ;;  %v777_v48 = vrot.slane %v739_v47, %v4306_v51  ;;  %v773_v49 = vrot.slane %v4978_v61, %v772_v46  ;;  %p3924_p0 = scmp.ne.s32.totalorder %s2917_s30, %s3923_s8  ;;  %p3929_p2 = scmp.lt.s32.totalorder %s3923_s8, %s3923_s8 }
 0x2b6   :  { %2785 = vmatprep.subr.bf16.mxu1 %v3864_v13  ;;  %v781_v13 = vrot.slane %v739_v47, %v4313_v54 }
 0x2b7   :  { %p3930_p3 = por %p3929_p2, %p3928_p1 }
 0x2b8   :  { %v3888_v59 = vpop.eup %3887  ;;  %2704 = vmatpush1.bf16.msra.mxu0 %v3859_v53 }
 0x2b9   :  { %v3890_v62 = vpop.eup %3889  ;;  %2786 = vmatpush1.bf16.msra.mxu1 %v3862_v56  ;;  %2705 = vmatprep.subr.bf16.mxu0 %v3867_v57  ;;  %p3931_p4 = pnand %p3930_p3, %p3924_p0 }
 0x2ba   :  { %2787 = vmatprep.subr.bf16.mxu1 %v3870_v58  ;;  %v3297_v2 = vpack.c.bf16 %v3890_v62, %v3888_v59 }
 0x2bc   :  { %2706 = vmatpush1.bf16.msra.mxu0 %v3865_v60  ;;  %2902 = vst [vmem:[#allocation2] sm:$0xff] %v3297_v2 }
 0x2bd   :  { %2788 = vmatpush1.bf16.msra.mxu1 %v3868_v63  ;;  %2707 = vmatprep.subr.bf16.mxu0 %v3873_v0 }
 0x2be   :  { %2789 = vmatprep.subr.bf16.mxu1 %v3876_v1 }
 0x2c0   :  { %2708 = vmatpush1.bf16.msra.mxu0 %v3871_v3 }
 0x2c1   :  { %2790 = vmatpush1.bf16.msra.mxu1 %v3874_v4  ;;  %2709 = vmatprep.subr.bf16.mxu0 %v3879_v5 }
 0x2c2   :  { %2791 = vmatprep.subr.bf16.mxu1 %v3882_v6 }
 0x2c4   :  { %2710 = vmatpush1.bf16.msra.mxu0 %v3877_v7 }
 0x2c5   :  { %2792 = vmatpush1.bf16.msra.mxu1 %v3880_v8 }
 0x2c7   :  { %2712 = vmatmul.mubr.bf16.vlgmr.msra.gmra.mrb[16].mxu0 %v4334_v17 }
 0x2c8   :  { %2794 = vmatmul.mubr.bf16.vlgmr.msra.gmra.mrb[12].mxu1 %v4334_v17 }
 0x31a   :  { %v2549_v19 = vpop.f32.mrb[12].mxu0 }
 0x31b   :  { %v3323_v20 = vadd.f32 %v2549_v19, %v753_v11  ;;  %v2631_v21 = vpop.f32.mrb[8].mxu1  ;;  %v2551_v17 = vpop.f32.mrb[13].mxu0 }
 0x31c   :  { %v3325_v22 = vadd.f32 %v2631_v21, %v761_v14  ;;  %v3324_v23 = vadd.f32 %v2551_v17, %v757_v15  ;;  %v2633_v24 = vpop.f32.mrb[9].mxu1  ;;  %v2553_v25 = vpop.f32.mrb[14].mxu0 }
 0x31d   :  { %v3284_v26 = vmul.f32 -1.442695, %v3323_v20  ;;  %v3326_v27 = vadd.f32 %v2633_v24, %v765_v18  ;;  %v2635_v28 = vpop.f32.mrb[10].mxu1  ;;  %v2554_v52 = vpop.f32.mrb[15].mxu0 }
 0x31e   :  { %v3286_v29 = vmul.f32 -1.442695, %v3325_v22  ;;  %v3285_v30 = vmul.f32 -1.442695, %v3324_v23  ;;  %v2636_v31 = vpop.f32.mrb[11].mxu1 }
 0x31f   :  { %3891 = vpow2.f32 %v3284_v26  ;;  %v3287_v32 = vmul.f32 -1.442695, %v3326_v27 }
 0x320   :  { %3893 = vpow2.f32 %v3286_v29 }
 0x321   :  { %3895 = vpow2.f32 %v3285_v30 }
 0x322   :  { %3897 = vpow2.f32 %v3287_v32 }
 0x329   :  { %v3892_v55 = vpop.eup %3891 }
 0x32a   :  { %v3894_v33 = vpop.eup %3893  ;;  %v2834_v34 = vadd.f32 1.0, %v3892_v55 }
 0x32b   :  { %v3896_v35 = vpop.eup %3895  ;;  %v2836_v36 = vadd.f32 1.0, %v3894_v33 }
 0x32c   :  { %v3898_v37 = vpop.eup %3897  ;;  %3899 = vrcp.f32 %v2834_v34  ;;  %v2835_v38 = vadd.f32 1.0, %v3896_v35 }
 0x32d   :  { %3901 = vrcp.f32 %v2836_v36  ;;  %v2837_v39 = vadd.f32 1.0, %v3898_v37 }
 0x32e   :  { %3903 = vrcp.f32 %v2835_v38 }
 0x32f   :  { %3905 = vrcp.f32 %v2837_v39 }
 0x336   :  { %v3900_v40 = vpop.eup %3899 }
 0x337   :  { %v3902_v41 = vpop.eup %3901 }
 0x338   :  { %v3904_v42 = vpop.eup %3903 }
 0x339   :  { %v3906_v43 = vpop.eup %3905  ;;  %v3298_v12 = vpack.c.bf16 %v3904_v42, %v3900_v40 }
 0x33a   :  { %v3299_v44 = vpack.c.bf16 %v3906_v43, %v3902_v41 }
 0x33b   :  { %2903 = vst [vmem:[#allocation2 + $0x8] sm:$0xff] %v3298_v12 }
 0x33c   :  { %2904 = vst [vmem:[#allocation2 + $0x10] sm:$0xff] %v3299_v44 }
 0x39a   :  { %v2713_v53 = vpop.f32.mrb[16].mxu0 }
 0x39b   :  { %v3327_v56 = vadd.f32 %v2713_v53, %v769_v16  ;;  %v2795_v57 = vpop.f32.mrb[12].mxu1  ;;  %v2715_v58 = vpop.f32.mrb[17].mxu0 }
 0x39c   :  { %v3329_v59 = vadd.f32 %v2795_v57, %v777_v48  ;;  %v3328_v60 = vadd.f32 %v2715_v58, %v773_v49  ;;  %v2797_v62 = vpop.f32.mrb[13].mxu1  ;;  %v2717_v50 = vpop.f32.mrb[18].mxu0 }
 0x39d   :  { %v3288_v63 = vmul.f32 -1.442695, %v3327_v56  ;;  %v3330_v0 = vadd.f32 %v2797_v62, %v781_v13  ;;  %v2799_v1 = vpop.f32.mrb[14].mxu1  ;;  %v2718_v2 = vpop.f32.mrb[19].mxu0 }
 0x39e   :  { %v3290_v3 = vmul.f32 -1.442695, %v3329_v59  ;;  %v3289_v4 = vmul.f32 -1.442695, %v3328_v60  ;;  %v2800_v5 = vpop.f32.mrb[15].mxu1 }
 0x39f   :  { %3907 = vpow2.f32 %v3288_v63  ;;  %v3291_v51 = vmul.f32 -1.442695, %v3330_v0 }
 0x3a0   :  { %3909 = vpow2.f32 %v3290_v3 }
 0x3a1   :  { %3911 = vpow2.f32 %v3289_v4 }
 0x3a2   :  { %3913 = vpow2.f32 %v3291_v51 }
 0x3a9   :  { %v3908_v54 = vpop.eup %3907 }
 0x3aa   :  { %v3910_v61 = vpop.eup %3909  ;;  %v2838_v6 = vadd.f32 1.0, %v3908_v54 }
 0x3ab   :  { %v3912_v7 = vpop.eup %3911  ;;  %v2840_v8 = vadd.f32 1.0, %v3910_v61 }
 0x3ac   :  { %v3914_v9 = vpop.eup %3913  ;;  %3915 = vrcp.f32 %v2838_v6  ;;  %v2839_v10 = vadd.f32 1.0, %v3912_v7 }
 0x3ad   :  { %3917 = vrcp.f32 %v2840_v8  ;;  %v2841_v11 = vadd.f32 1.0, %v3914_v9 }
 0x3ae   :  { %3919 = vrcp.f32 %v2839_v10 }
 0x3af   :  { %3921 = vrcp.f32 %v2841_v11 }
 0x3b6   :  { %v3916_v14 = vpop.eup %3915 }
 0x3b7   :  { %v3918_v15 = vpop.eup %3917 }
 0x3b8   :  { %v3920_v18 = vpop.eup %3919 }
 0x3b9   :  { %v3922_v19 = vpop.eup %3921  ;;  %v3300_v20 = vpack.c.bf16 %v3920_v18, %v3916_v14 }
 0x3ba   :  { %v3301_v21 = vpack.c.bf16 %v3922_v19, %v3918_v15 }
 0x3bb   :  { %2905 = vst [vmem:[#allocation2 + $0x18] sm:$0xff] %v3300_v20 }
 0x3bc   :  { %2909 = vst.msk [vmem:[#allocation2 + $0x20] sm:$0xff] %vm2908_vm4, %v3301_v21 }
 0x3bd   :  { %3934 = shalt.err (!%p3931_p4)
}
 0x3be   :  { %s3935_s0 = scalar_lea.hbm %s5159_s7, 640 }
 0x3bf   :  { %p3936_p5 = scmp.ne.s32.totalorder %s5159_s7, %s3935_s0  ;;  %p3939_p6 = scmp.lt.u32.totalorder %s3935_s0, %s5159_s7 }
 0x3c1   :  { %p3941_p7 = pnand %p3939_p6, %p3936_p5 }
 0x3c3   :  { %3944 = shalt.err (!%p3941_p7)
}
 0x3c4   :  { %2919 = dma.vmem_to_hbm [thread:$0]  %s2917_s30, 640, %s5159_s7, [#allocation3]  }
 0x3c5   :  { %3945 = dma.done.wait [#allocation3], 640  }
 0x3c6   :  { %3946 = vsyncadd [#allocation3], 4294966656 }
 0x3c7   :  { %2923 = vsyncpa [#allocation3], 1 }

</bundles_post_ra>
